<compile_context>
chip_gen: v5e
topology: v5e:2x2
jax: 0.10.0
libtpu: 0.0.40
codegen_flags: <defaults>
</compile_context>

<pallas_src>
import functools

import jax
import jax.numpy as jnp
from jax.experimental import pallas as pl
from jax.experimental.pallas import tpu as pltpu


_WEIGHT_KEYS = ("wq", "wk", "wv", "wo", "bo", "g1", "b1",
                "w1", "bf1", "w2", "bf2", "g2", "b2")


# ----------------------------- Pallas kernel -------------------------------


def _layer_norm(v, gamma, beta, eps=1e-5):
    mu = jnp.mean(v, axis=-1, keepdims=True)
    var = jnp.mean((v - mu) ** 2, axis=-1, keepdims=True)
    return (v - mu) * jax.lax.rsqrt(var + eps) * gamma + beta


def encoder_block_kernel(
    bias_ref,                  # (Bt, 1, S)  additive attention-mask bias (f32)
    x0_ref,                    # (Bt, S, E)  initial embeddings (f32)
    wq_ref, wk_ref, wv_ref,    # (1, Dh, Dh) [in, out]; 1/sqrt(E) folded into wq
    wo_ref,                    # (1, H, Dh, E) [head, head_in, out]
    bo_ref,                    # (1, 1, E)
    g1_ref, b1_ref,            # (1, 1, E)
    w1_ref, bf1_ref,           # (1, E, F) [in, out], (1, 1, F)
    w2_ref, bf2_ref,           # (1, F, E) [in, out], (1, 1, E)
    g2_ref, b2_ref,            # (1, 1, E)
    out_ref,                   # (Bt, S, E) f32; resident across the layer axis
    *, heads: int, compute_dtype,
):
    layer = pl.program_id(1)

    # Layer 0: seed the resident activation block with the embeddings.
    @pl.when(layer == 0)
    def _():
        out_ref[...] = x0_ref[...]

    x = out_ref[...]                       # (Bt, S, E) activation, f32
    Bt, S, E = x.shape
    Dh = E // heads
    M = Bt * S

    x2 = x.reshape(M, E)                   # leading-dim merge: free
    xc = x2.astype(compute_dtype)          # MXU input dtype (bf16 on v6e/v7x)

    # Additive mask bias, broadcast once per grid step (hoisted out of the
    # per-head loop; the select already happened in the wrapper).
    bias = jnp.broadcast_to(bias_ref[...], (Bt, S, S))

    # Multi-head attention.  `heads` is a small static int -> unrolled loop.
    # Per-head (Dh, Dh) projections (no block-diagonal waste); per-head WO
    # contribution accumulated as a K-split matmul (no slab, no concat).
    attn = jnp.zeros((M, E), dtype=jnp.float32)
    for h in range(heads):
        sl = slice(h * Dh, (h + 1) * Dh)
        xh = xc[:, sl]                                               # (M, Dh)
        qh = jnp.dot(xh, wq_ref[0], preferred_element_type=jnp.float32)
        kh = jnp.dot(xh, wk_ref[0], preferred_element_type=jnp.float32)
        vh = jnp.dot(xh, wv_ref[0], preferred_element_type=jnp.float32)
        qb = qh.reshape(Bt, S, Dh).astype(compute_dtype)
        kb = kh.reshape(Bt, S, Dh).astype(compute_dtype)
        vb = vh.reshape(Bt, S, Dh).astype(compute_dtype)

        # scores: scale is pre-folded into wq, mask is a plain add.
        energy = jnp.einsum("bqd,bkd->bqk", qb, kb,
                            preferred_element_type=jnp.float32)     # (Bt,S,S)
        energy = energy + bias

        m = jnp.max(energy, axis=-1, keepdims=True)
        p = jnp.exp(energy - m)
        denom = jnp.sum(p, axis=-1, keepdims=True)
        att = p * pl.reciprocal(denom, approx=True)                  # (Bt,S,S)

        oh = jnp.einsum("bqk,bkd->bqd", att.astype(compute_dtype), vb,
                        preferred_element_type=jnp.float32)          # (Bt,S,Dh)

        attn = attn + jnp.dot(oh.reshape(M, Dh).astype(compute_dtype),
                              wo_ref[0, h],
                              preferred_element_type=jnp.float32)    # (M, E)

    attn = attn + bo_ref[0]

    # residual + norm1   (dropout = identity)
    n1 = _layer_norm(attn + x2, g1_ref[0], b1_ref[0])                # f32

    # feed forward: Linear -> ReLU -> Linear
    hidden = jnp.dot(n1.astype(compute_dtype), w1_ref[0],
                     preferred_element_type=jnp.float32) + bf1_ref[0]
    hidden = jnp.maximum(hidden, 0.0)
    ff = jnp.dot(hidden.astype(compute_dtype), w2_ref[0],
                 preferred_element_type=jnp.float32) + bf2_ref[0]

    # residual + norm2   (dropout = identity)
    out_ref[...] = _layer_norm(ff + n1, g2_ref[0], b2_ref[0]).reshape(Bt, S, E)


# --------------------------- wrapper (one call) ------------------------------


def _pack_layers(layers, embed_size, heads, compute_dtype):
    """Stack per-layer weights with a leading layer axis, pre-transposed to
    [in, out], scale folded into Wq, matmul weights cast to compute_dtype."""
    scale = 1.0 / (embed_size ** 0.5)   # PyTorch divides energy by sqrt(E)
    head_dim = embed_size // heads
    cast = lambda a: a.astype(compute_dtype)
    stk = lambda key, fn=(lambda a: a): jnp.stack([fn(L[key]) for L in layers])
    return {
        "wq": stk("wq", lambda w: cast(w.T * scale)),
        "wk": stk("wk", lambda w: cast(w.T)),
        "wv": stk("wv", lambda w: cast(w.T)),
        # WO stored head-major: (H, Dh, E) so the kernel indexes a leading dim
        # instead of slicing sublanes.
        "wo": stk("wo", lambda w: cast(w.T.reshape(heads, head_dim, embed_size))),
        "bo": stk("bo"),
        "g1": stk("g1"), "b1": stk("b1"),
        "w1": stk("w1", lambda w: cast(w.T)),
        "bf1": stk("bf1"),
        "w2": stk("w2", lambda w: cast(w.T)),
        "bf2": stk("bf2"),
        "g2": stk("g2"), "b2": stk("b2"),
    }


def _pick_batch_block(n, s, target_rows=1024):
    """Largest divisor of n with Bt*S <= target_rows (fills the MXU M dim)."""
    bt = 1
    for cand in range(1, n + 1):
        if n % cand == 0 and cand * s <= max(target_rows, s):
            bt = cand
    return bt


def encoder_forward(params, tokens, mask, *, heads,
                    compute_dtype=jnp.bfloat16, batch_block=None):
    """tokens: [N, S] int32, mask: [N, 1, S] float32 (1 = keep, 0 = masked)."""
    N, S = tokens.shape
    E = params["word_emb"].shape[1]
    L = len(params["layers"])

    # Embedding lookups (gathers) as plain-JAX glue; dropout = identity.
    word = jnp.take(params["word_emb"], tokens, axis=0)          # (N, S, E)
    pos = params["pos_emb"][:S][None, :, :]                      # (1, S, E)
    x0 = (word + pos).astype(jnp.float32)

    # Additive attention bias precomputed once (kernel just adds it).
    bias = jnp.where(mask == 0.0, jnp.float32(-1e20), jnp.float32(0.0))

    packed = _pack_layers(params["layers"], E, heads, compute_dtype)

    Bt = batch_block if batch_block is not None else _pick_batch_block(N, S)
    assert N % Bt == 0

    act_spec = pl.BlockSpec((Bt, S, E), lambda n, l: (n, 0, 0))
    bias_spec = pl.BlockSpec((Bt, 1, S), lambda n, l: (n, 0, 0))

    def wspec(arr):
        nd = arr.ndim
        return pl.BlockSpec((1,) + arr.shape[1:],
                            lambda n, l, _nd=nd: (l,) + (0,) * (_nd - 1))

    # Generation-aware VMEM limit: leave headroom on v7x (64 MiB per core).
    try:
        vmem_cap = pltpu.get_tpu_info().vmem_capacity_bytes
    except Exception:
        vmem_cap = 64 * 1024 * 1024
    vmem_limit = max(32 * 1024 * 1024,
                     min(int(vmem_cap) * 3 // 4, 100 * 1024 * 1024))

    kernel = functools.partial(encoder_block_kernel, heads=heads,
                               compute_dtype=compute_dtype)

    return pl.pallas_call(
        kernel,
        out_shape=jax.ShapeDtypeStruct((N, S, E), jnp.float32),
        grid=(N // Bt, L),
        in_specs=[bias_spec, act_spec] + [wspec(packed[k]) for k in _WEIGHT_KEYS],
        out_specs=act_spec,
        compiler_params=pltpu.CompilerParams(
            dimension_semantics=("parallel", "arbitrary"),
            vmem_limit_bytes=vmem_limit,
        ),
    )(bias, x0, *(packed[k] for k in _WEIGHT_KEYS))


# ------------------------------ params --------------------------------------


def init_encoder_params(key, *, src_vocab_size, embed_size, num_layers, heads,
                        forward_expansion, max_length):
    head_dim = embed_size // heads
    ff = forward_expansion * embed_size
    keys = jax.random.split(key, 2 + num_layers * 7)
    normal = lambda k, shape: (0.05 * jax.random.normal(k, shape)).astype(jnp.float32)

    params = {
        "word_emb": normal(keys[0], (src_vocab_size, embed_size)),
        "pos_emb": normal(keys[1], (max_length, embed_size)),
        "layers": [],
    }
    for l in range(num_layers):
        k = keys[2 + l * 7: 2 + (l + 1) * 7]
        layer = {
            "wv": normal(k[0], (head_dim, head_dim)),
            "wk": normal(k[1], (head_dim, head_dim)),
            "wq": normal(k[2], (head_dim, head_dim)),
            "wo": normal(k[3], (embed_size, embed_size)),
            "bo": jnp.zeros((1, embed_size), jnp.float32),
            "g1": jnp.ones((1, embed_size), jnp.float32),
            "b1": jnp.zeros((1, embed_size), jnp.float32),
            "w1": normal(k[4], (ff, embed_size)),
            "bf1": jnp.zeros((1, ff), jnp.float32),
            "w2": normal(k[5], (embed_size, ff)),
            "bf2": jnp.zeros((1, embed_size), jnp.float32),
            "g2": jnp.ones((1, embed_size), jnp.float32),
            "b2": jnp.zeros((1, embed_size), jnp.float32),
        }
        params["layers"].append(layer)
    return params


# ----------------------------- reference (JAX) ------------------------------


def _ref_block(x, mask, p, heads):
    N, S, E = x.shape
    Dh = E // heads
    xh = x.reshape(N, S, heads, Dh)
    v = jnp.einsum("nshd,ed->nshe", xh, p["wv"])
    k = jnp.einsum("nshd,ed->nshe", xh, p["wk"])
    q = jnp.einsum("nshd,ed->nshe", xh, p["wq"])
    energy = jnp.einsum("nqhd,nkhd->nhqk", q, k)
    energy = jnp.where(mask[:, None, :, :] == 0.0, -1e20, energy)
    att = jax.nn.softmax(energy / (E ** 0.5), axis=3)
    out = jnp.einsum("nhql,nlhd->nqhd", att, v).reshape(N, S, E)
    attn = out @ p["wo"].T + p["bo"]

    def ln(v_, g, b):
        mu = jnp.mean(v_, -1, keepdims=True)
        var = jnp.mean((v_ - mu) ** 2, -1, keepdims=True)
        return (v_ - mu) / jnp.sqrt(var + 1e-5) * g + b

    n1 = ln(attn + x, p["g1"], p["b1"])
    ff = jnp.maximum(n1 @ p["w1"].T + p["bf1"], 0.0) @ p["w2"].T + p["bf2"]
    return ln(ff + n1, p["g2"], p["b2"])


def encoder_ref(params, tokens, mask, *, heads):
    N, S = tokens.shape
    out = jnp.take(params["word_emb"], tokens, axis=0) + params["pos_emb"][:S][None]
    for layer in params["layers"]:
        out = _ref_block(out, mask, layer, heads)
    return out


# ---------------------------------- main ------------------------------------


if __name__ == "__main__":
    N, S = 2, 8
    embed_size, heads, num_layers, forward_expansion = 32, 4, 2, 2
    src_vocab_size, max_length = 50, 16

    key = jax.random.PRNGKey(0)
    kp, kt = jax.random.split(key)
    params = init_encoder_params(
        kp, src_vocab_size=src_vocab_size, embed_size=embed_size,
        num_layers=num_layers, heads=heads,
        forward_expansion=forward_expansion, max_length=max_length)

    tokens = jax.random.randint(kt, (N, S), 0, src_vocab_size, dtype=jnp.int32)
    # mask: keep everything except the last key position of batch 1
    mask = jnp.ones((N, 1, S), jnp.float32).at[1, 0, S - 1].set(0.0)

    ref = encoder_ref(params, tokens, mask, heads=heads)

    # Exact path (f32 MXU inputs): tight parity with the f32 reference.
    out_f32 = jax.block_until_ready(
        encoder_forward(params, tokens, mask, heads=heads,
                        compute_dtype=jnp.float32))
    assert jnp.allclose(out_f32, ref, atol=2e-3, rtol=2e-3), \
        "f32 mismatch vs JAX reference"

    # Performance path (bf16 MXU inputs, f32 accumulate / LayerNorm / softmax).
    out_bf16 = jax.block_until_ready(
        encoder_forward(params, tokens, mask, heads=heads,
                        compute_dtype=jnp.bfloat16))
    assert jnp.allclose(out_bf16, ref, atol=1e-1, rtol=1e-1), \
        "bf16 mismatch vs JAX reference"

    print("KERNEL_OK")
</pallas_src>

<mosaic_0001>
module attributes {stable_mosaic.version = 11 : i64} {
  func.func @encoder_block_kernel(%arg0: i32, %arg1: i32, %arg2: memref<2x1x8xf32, #tpu.memory_space<vmem>>, %arg3: memref<2x8x32xf32, #tpu.memory_space<vmem>>, %arg4: memref<1x8x8xf32, #tpu.memory_space<vmem>>, %arg5: memref<1x8x8xf32, #tpu.memory_space<vmem>>, %arg6: memref<1x8x8xf32, #tpu.memory_space<vmem>>, %arg7: memref<1x4x8x32xf32, #tpu.memory_space<vmem>>, %arg8: memref<1x1x32xf32, #tpu.memory_space<vmem>>, %arg9: memref<1x1x32xf32, #tpu.memory_space<vmem>>, %arg10: memref<1x1x32xf32, #tpu.memory_space<vmem>>, %arg11: memref<1x32x64xf32, #tpu.memory_space<vmem>>, %arg12: memref<1x1x64xf32, #tpu.memory_space<vmem>>, %arg13: memref<1x64x32xf32, #tpu.memory_space<vmem>>, %arg14: memref<1x1x32xf32, #tpu.memory_space<vmem>>, %arg15: memref<1x1x32xf32, #tpu.memory_space<vmem>>, %arg16: memref<1x1x32xf32, #tpu.memory_space<vmem>>, %arg17: memref<2x8x32xf32, #tpu.memory_space<vmem>>) attributes {dimension_semantics = [#tpu.dimension_semantics<parallel>, #tpu.dimension_semantics<arbitrary>], iteration_bounds = array<i64: 1, 2>, scalar_prefetch = 0 : i64, scratch_operands = 0 : i64, tpu.core_type = #tpu.core_type<tc>, window_params = [{transform_indices = @transform_0, window_bounds = array<i64: 2, 1, 8>}, {transform_indices = @transform_1, window_bounds = array<i64: 2, 8, 32>}, {transform_indices = @transform_2, window_bounds = array<i64: 1, 8, 8>}, {transform_indices = @transform_3, window_bounds = array<i64: 1, 8, 8>}, {transform_indices = @transform_4, window_bounds = array<i64: 1, 8, 8>}, {transform_indices = @transform_5, window_bounds = array<i64: 1, 4, 8, 32>}, {transform_indices = @transform_6, window_bounds = array<i64: 1, 1, 32>}, {transform_indices = @transform_7, window_bounds = array<i64: 1, 1, 32>}, {transform_indices = @transform_8, window_bounds = array<i64: 1, 1, 32>}, {transform_indices = @transform_9, window_bounds = array<i64: 1, 32, 64>}, {transform_indices = @transform_10, window_bounds = array<i64: 1, 1, 64>}, {transform_indices = @transform_11, window_bounds = array<i64: 1, 64, 32>}, {transform_indices = @transform_12, window_bounds = array<i64: 1, 1, 32>}, {transform_indices = @transform_13, window_bounds = array<i64: 1, 1, 32>}, {transform_indices = @transform_14, window_bounds = array<i64: 1, 1, 32>}, {transform_indices = @transform_15, window_bounds = array<i64: 2, 8, 32>}]} {
    %c0_i32 = arith.constant 0 : i32
    %0 = arith.cmpi eq, %arg1, %c0_i32 : i32
    %1 = arith.extui %0 : i1 to i32
    %c0_i32_0 = arith.constant 0 : i32
    %2 = arith.cmpi ne, %1, %c0_i32_0 : i32
    scf.if %2 {
      %c0_130 = arith.constant 0 : index
      %c0_131 = arith.constant 0 : index
      %c0_132 = arith.constant 0 : index
      %209 = vector.load %arg3[%c0_130, %c0_131, %c0_132] : memref<2x8x32xf32, #tpu.memory_space<vmem>>, vector<2x8x32xf32>
      %c0_133 = arith.constant 0 : index
      %c0_134 = arith.constant 0 : index
      %c0_135 = arith.constant 0 : index
      %210 = vector.load %arg17[%c0_133, %c0_134, %c0_135] : memref<2x8x32xf32, #tpu.memory_space<vmem>>, vector<2x8x32xf32>
      tpu.vector_store %arg17[%c0_133, %c0_134, %c0_135], %209 {strides = array<i32>} : memref<2x8x32xf32, #tpu.memory_space<vmem>>, vector<2x8x32xf32>,
    } else {
    }
    %c0 = arith.constant 0 : index
    %c0_1 = arith.constant 0 : index
    %c0_2 = arith.constant 0 : index
    %3 = vector.load %arg17[%c0, %c0_1, %c0_2] : memref<2x8x32xf32, #tpu.memory_space<vmem>>, vector<2x8x32xf32>
    %4 = vector.shape_cast %3 : vector<2x8x32xf32> to vector<16x32xf32>
    %c0_3 = arith.constant 0 : index
    %c0_4 = arith.constant 0 : index
    %c0_5 = arith.constant 0 : index
    %5 = vector.load %arg2[%c0_3, %c0_4, %c0_5] : memref<2x1x8xf32, #tpu.memory_space<vmem>>, vector<2x1x8xf32>
    %6 = vector.shape_cast %5 : vector<2x1x8xf32> to vector<2x1x8xf32>
    %7 = vector.broadcast %6 : vector<2x1x8xf32> to vector<2x8x8xf32>
    %cst = arith.constant 0.000000e+00 : f32
    %8 = vector.broadcast %cst : f32 to vector<16x32xf32>
    %9 = vector.extract_strided_slice %4 {offsets = [0, 0], sizes = [16, 8], strides = [1, 1]} : vector<16x32xf32> to vector<16x8xf32>
    %c0_6 = arith.constant 0 : index
    %c0_7 = arith.constant 0 : index
    %c0_8 = arith.constant 0 : index
    %10 = vector.load %arg4[%c0_6, %c0_7, %c0_8] : memref<1x8x8xf32, #tpu.memory_space<vmem>>, vector<1x8x8xf32>
    %11 = vector.shape_cast %10 : vector<1x8x8xf32> to vector<8x8xf32>
    %cst_9 = arith.constant dense<0.000000e+00> : vector<16x8xf32>
    %12 = tpu.matmul %9, %11, %cst_9 {dimension_numbers = #tpu.dot_dimension_numbers<[1], [0], [0], [1], [0, 0, 1, 1], [], []>} : vector<16x8xf32>, vector<8x8xf32>, vector<16x8xf32> -> vector<16x8xf32>
    %c0_10 = arith.constant 0 : index
    %c0_11 = arith.constant 0 : index
    %c0_12 = arith.constant 0 : index
    %13 = vector.load %arg5[%c0_10, %c0_11, %c0_12] : memref<1x8x8xf32, #tpu.memory_space<vmem>>, vector<1x8x8xf32>
    %14 = vector.shape_cast %13 : vector<1x8x8xf32> to vector<8x8xf32>
    %cst_13 = arith.constant dense<0.000000e+00> : vector<16x8xf32>
    %15 = tpu.matmul %9, %14, %cst_13 {dimension_numbers = #tpu.dot_dimension_numbers<[1], [0], [0], [1], [0, 0, 1, 1], [], []>} : vector<16x8xf32>, vector<8x8xf32>, vector<16x8xf32> -> vector<16x8xf32>
    %c0_14 = arith.constant 0 : index
    %c0_15 = arith.constant 0 : index
    %c0_16 = arith.constant 0 : index
    %16 = vector.load %arg6[%c0_14, %c0_15, %c0_16] : memref<1x8x8xf32, #tpu.memory_space<vmem>>, vector<1x8x8xf32>
    %17 = vector.shape_cast %16 : vector<1x8x8xf32> to vector<8x8xf32>
    %cst_17 = arith.constant dense<0.000000e+00> : vector<16x8xf32>
    %18 = tpu.matmul %9, %17, %cst_17 {dimension_numbers = #tpu.dot_dimension_numbers<[1], [0], [0], [1], [0, 0, 1, 1], [], []>} : vector<16x8xf32>, vector<8x8xf32>, vector<16x8xf32> -> vector<16x8xf32>
    %19 = vector.shape_cast %12 : vector<16x8xf32> to vector<2x8x8xf32>
    %20 = vector.shape_cast %15 : vector<16x8xf32> to vector<2x8x8xf32>
    %21 = vector.shape_cast %18 : vector<16x8xf32> to vector<2x8x8xf32>
    "tpu.trace_start"() <{level = 10 : i32, message = "bqd,bkd->bqk"}> : () -> ()
    %cst_18 = arith.constant dense<0.000000e+00> : vector<2x8x8xf32>
    %22 = tpu.matmul %19, %20, %cst_18 {dimension_numbers = #tpu.dot_dimension_numbers<[2], [2], [1], [1], [0, 0, 0, 1, 1, 1], [0], [0]>} : vector<2x8x8xf32>, vector<2x8x8xf32>, vector<2x8x8xf32> -> vector<2x8x8xf32>
    "tpu.trace_stop"() : () -> ()
    %23 = arith.addf %22, %7 : vector<2x8x8xf32>
    %cst_19 = arith.constant dense<0xFF800000> : vector<2x8xf32>
    %24 = vector.multi_reduction <maximumf>, %23, %cst_19 [2] : vector<2x8x8xf32> to vector<2x8xf32>
    %25 = vector.shape_cast %24 : vector<2x8xf32> to vector<2x8x1xf32>
    %26 = vector.broadcast %25 : vector<2x8x1xf32> to vector<2x8x8xf32>
    %27 = arith.subf %23, %26 : vector<2x8x8xf32>
    %28 = math.exp %27 : vector<2x8x8xf32>
    %cst_20 = arith.constant dense<0.000000e+00> : vector<2x8xf32>
    %29 = vector.multi_reduction <add>, %28, %cst_20 [2] : vector<2x8x8xf32> to vector<2x8xf32>
    %30 = vector.shape_cast %29 : vector<2x8xf32> to vector<2x8x1xf32>
    %31 = tpu.reciprocal %30 {approx = true} : vector<2x8x1xf32> -> vector<2x8x1xf32>
    %32 = vector.broadcast %31 : vector<2x8x1xf32> to vector<2x8x8xf32>
    %33 = arith.mulf %28, %32 : vector<2x8x8xf32>
    "tpu.trace_start"() <{level = 10 : i32, message = "bqk,bkd->bqd"}> : () -> ()
    %cst_21 = arith.constant dense<0.000000e+00> : vector<2x8x8xf32>
    %34 = tpu.matmul %33, %21, %cst_21 {dimension_numbers = #tpu.dot_dimension_numbers<[2], [1], [1], [2], [0, 0, 0, 1, 1, 2], [0], [0]>} : vector<2x8x8xf32>, vector<2x8x8xf32>, vector<2x8x8xf32> -> vector<2x8x8xf32>
    "tpu.trace_stop"() : () -> ()
    %35 = vector.shape_cast %34 : vector<2x8x8xf32> to vector<16x8xf32>
    %c0_22 = arith.constant 0 : index
    %c0_23 = arith.constant 0 : index
    %c0_24 = arith.constant 0 : index
    %c0_25 = arith.constant 0 : index
    %36 = vector.load %arg7[%c0_22, %c0_23, %c0_24, %c0_25] : memref<1x4x8x32xf32, #tpu.memory_space<vmem>>, vector<1x1x8x32xf32>
    %37 = vector.shape_cast %36 : vector<1x1x8x32xf32> to vector<8x32xf32>
    %cst_26 = arith.constant dense<0.000000e+00> : vector<16x32xf32>
    %38 = tpu.matmul %35, %37, %cst_26 {dimension_numbers = #tpu.dot_dimension_numbers<[1], [0], [0], [1], [0, 0, 1, 1], [], []>} : vector<16x8xf32>, vector<8x32xf32>, vector<16x32xf32> -> vector<16x32xf32>
    %39 = arith.addf %8, %38 : vector<16x32xf32>
    %40 = vector.extract_strided_slice %4 {offsets = [0, 8], sizes = [16, 8], strides = [1, 1]} : vector<16x32xf32> to vector<16x8xf32>
    %c0_27 = arith.constant 0 : index
    %c0_28 = arith.constant 0 : index
    %c0_29 = arith.constant 0 : index
    %41 = vector.load %arg4[%c0_27, %c0_28, %c0_29] : memref<1x8x8xf32, #tpu.memory_space<vmem>>, vector<1x8x8xf32>
    %42 = vector.shape_cast %41 : vector<1x8x8xf32> to vector<8x8xf32>
    %cst_30 = arith.constant dense<0.000000e+00> : vector<16x8xf32>
    %43 = tpu.matmul %40, %42, %cst_30 {dimension_numbers = #tpu.dot_dimension_numbers<[1], [0], [0], [1], [0, 0, 1, 1], [], []>} : vector<16x8xf32>, vector<8x8xf32>, vector<16x8xf32> -> vector<16x8xf32>
    %c0_31 = arith.constant 0 : index
    %c0_32 = arith.constant 0 : index
    %c0_33 = arith.constant 0 : index
    %44 = vector.load %arg5[%c0_31, %c0_32, %c0_33] : memref<1x8x8xf32, #tpu.memory_space<vmem>>, vector<1x8x8xf32>
    %45 = vector.shape_cast %44 : vector<1x8x8xf32> to vector<8x8xf32>
    %cst_34 = arith.constant dense<0.000000e+00> : vector<16x8xf32>
    %46 = tpu.matmul %40, %45, %cst_34 {dimension_numbers = #tpu.dot_dimension_numbers<[1], [0], [0], [1], [0, 0, 1, 1], [], []>} : vector<16x8xf32>, vector<8x8xf32>, vector<16x8xf32> -> vector<16x8xf32>
    %c0_35 = arith.constant 0 : index
    %c0_36 = arith.constant 0 : index
    %c0_37 = arith.constant 0 : index
    %47 = vector.load %arg6[%c0_35, %c0_36, %c0_37] : memref<1x8x8xf32, #tpu.memory_space<vmem>>, vector<1x8x8xf32>
    %48 = vector.shape_cast %47 : vector<1x8x8xf32> to vector<8x8xf32>
    %cst_38 = arith.constant dense<0.000000e+00> : vector<16x8xf32>
    %49 = tpu.matmul %40, %48, %cst_38 {dimension_numbers = #tpu.dot_dimension_numbers<[1], [0], [0], [1], [0, 0, 1, 1], [], []>} : vector<16x8xf32>, vector<8x8xf32>, vector<16x8xf32> -> vector<16x8xf32>
    %50 = vector.shape_cast %43 : vector<16x8xf32> to vector<2x8x8xf32>
    %51 = vector.shape_cast %46 : vector<16x8xf32> to vector<2x8x8xf32>
    %52 = vector.shape_cast %49 : vector<16x8xf32> to vector<2x8x8xf32>
    "tpu.trace_start"() <{level = 10 : i32, message = "bqd,bkd->bqk"}> : () -> ()
    %cst_39 = arith.constant dense<0.000000e+00> : vector<2x8x8xf32>
    %53 = tpu.matmul %50, %51, %cst_39 {dimension_numbers = #tpu.dot_dimension_numbers<[2], [2], [1], [1], [0, 0, 0, 1, 1, 1], [0], [0]>} : vector<2x8x8xf32>, vector<2x8x8xf32>, vector<2x8x8xf32> -> vector<2x8x8xf32>
    "tpu.trace_stop"() : () -> ()
    %54 = arith.addf %53, %7 : vector<2x8x8xf32>
    %cst_40 = arith.constant dense<0xFF800000> : vector<2x8xf32>
    %55 = vector.multi_reduction <maximumf>, %54, %cst_40 [2] : vector<2x8x8xf32> to vector<2x8xf32>
    %56 = vector.shape_cast %55 : vector<2x8xf32> to vector<2x8x1xf32>
    %57 = vector.broadcast %56 : vector<2x8x1xf32> to vector<2x8x8xf32>
    %58 = arith.subf %54, %57 : vector<2x8x8xf32>
    %59 = math.exp %58 : vector<2x8x8xf32>
    %cst_41 = arith.constant dense<0.000000e+00> : vector<2x8xf32>
    %60 = vector.multi_reduction <add>, %59, %cst_41 [2] : vector<2x8x8xf32> to vector<2x8xf32>
    %61 = vector.shape_cast %60 : vector<2x8xf32> to vector<2x8x1xf32>
    %62 = tpu.reciprocal %61 {approx = true} : vector<2x8x1xf32> -> vector<2x8x1xf32>
    %63 = vector.broadcast %62 : vector<2x8x1xf32> to vector<2x8x8xf32>
    %64 = arith.mulf %59, %63 : vector<2x8x8xf32>
    "tpu.trace_start"() <{level = 10 : i32, message = "bqk,bkd->bqd"}> : () -> ()
    %cst_42 = arith.constant dense<0.000000e+00> : vector<2x8x8xf32>
    %65 = tpu.matmul %64, %52, %cst_42 {dimension_numbers = #tpu.dot_dimension_numbers<[2], [1], [1], [2], [0, 0, 0, 1, 1, 2], [0], [0]>} : vector<2x8x8xf32>, vector<2x8x8xf32>, vector<2x8x8xf32> -> vector<2x8x8xf32>
    "tpu.trace_stop"() : () -> ()
    %66 = vector.shape_cast %65 : vector<2x8x8xf32> to vector<16x8xf32>
    %c0_43 = arith.constant 0 : index
    %c1 = arith.constant 1 : index
    %c0_44 = arith.constant 0 : index
    %c0_45 = arith.constant 0 : index
    %67 = vector.load %arg7[%c0_43, %c1, %c0_44, %c0_45] : memref<1x4x8x32xf32, #tpu.memory_space<vmem>>, vector<1x1x8x32xf32>
    %68 = vector.shape_cast %67 : vector<1x1x8x32xf32> to vector<8x32xf32>
    %cst_46 = arith.constant dense<0.000000e+00> : vector<16x32xf32>
    %69 = tpu.matmul %66, %68, %cst_46 {dimension_numbers = #tpu.dot_dimension_numbers<[1], [0], [0], [1], [0, 0, 1, 1], [], []>} : vector<16x8xf32>, vector<8x32xf32>, vector<16x32xf32> -> vector<16x32xf32>
    %70 = arith.addf %39, %69 : vector<16x32xf32>
    %71 = vector.extract_strided_slice %4 {offsets = [0, 16], sizes = [16, 8], strides = [1, 1]} : vector<16x32xf32> to vector<16x8xf32>
    %c0_47 = arith.constant 0 : index
    %c0_48 = arith.constant 0 : index
    %c0_49 = arith.constant 0 : index
    %72 = vector.load %arg4[%c0_47, %c0_48, %c0_49] : memref<1x8x8xf32, #tpu.memory_space<vmem>>, vector<1x8x8xf32>
    %73 = vector.shape_cast %72 : vector<1x8x8xf32> to vector<8x8xf32>
    %cst_50 = arith.constant dense<0.000000e+00> : vector<16x8xf32>
    %74 = tpu.matmul %71, %73, %cst_50 {dimension_numbers = #tpu.dot_dimension_numbers<[1], [0], [0], [1], [0, 0, 1, 1], [], []>} : vector<16x8xf32>, vector<8x8xf32>, vector<16x8xf32> -> vector<16x8xf32>
    %c0_51 = arith.constant 0 : index
    %c0_52 = arith.constant 0 : index
    %c0_53 = arith.constant 0 : index
    %75 = vector.load %arg5[%c0_51, %c0_52, %c0_53] : memref<1x8x8xf32, #tpu.memory_space<vmem>>, vector<1x8x8xf32>
    %76 = vector.shape_cast %75 : vector<1x8x8xf32> to vector<8x8xf32>
    %cst_54 = arith.constant dense<0.000000e+00> : vector<16x8xf32>
    %77 = tpu.matmul %71, %76, %cst_54 {dimension_numbers = #tpu.dot_dimension_numbers<[1], [0], [0], [1], [0, 0, 1, 1], [], []>} : vector<16x8xf32>, vector<8x8xf32>, vector<16x8xf32> -> vector<16x8xf32>
    %c0_55 = arith.constant 0 : index
    %c0_56 = arith.constant 0 : index
    %c0_57 = arith.constant 0 : index
    %78 = vector.load %arg6[%c0_55, %c0_56, %c0_57] : memref<1x8x8xf32, #tpu.memory_space<vmem>>, vector<1x8x8xf32>
    %79 = vector.shape_cast %78 : vector<1x8x8xf32> to vector<8x8xf32>
    %cst_58 = arith.constant dense<0.000000e+00> : vector<16x8xf32>
    %80 = tpu.matmul %71, %79, %cst_58 {dimension_numbers = #tpu.dot_dimension_numbers<[1], [0], [0], [1], [0, 0, 1, 1], [], []>} : vector<16x8xf32>, vector<8x8xf32>, vector<16x8xf32> -> vector<16x8xf32>
    %81 = vector.shape_cast %74 : vector<16x8xf32> to vector<2x8x8xf32>
    %82 = vector.shape_cast %77 : vector<16x8xf32> to vector<2x8x8xf32>
    %83 = vector.shape_cast %80 : vector<16x8xf32> to vector<2x8x8xf32>
    "tpu.trace_start"() <{level = 10 : i32, message = "bqd,bkd->bqk"}> : () -> ()
    %cst_59 = arith.constant dense<0.000000e+00> : vector<2x8x8xf32>
    %84 = tpu.matmul %81, %82, %cst_59 {dimension_numbers = #tpu.dot_dimension_numbers<[2], [2], [1], [1], [0, 0, 0, 1, 1, 1], [0], [0]>} : vector<2x8x8xf32>, vector<2x8x8xf32>, vector<2x8x8xf32> -> vector<2x8x8xf32>
    "tpu.trace_stop"() : () -> ()
    %85 = arith.addf %84, %7 : vector<2x8x8xf32>
    %cst_60 = arith.constant dense<0xFF800000> : vector<2x8xf32>
    %86 = vector.multi_reduction <maximumf>, %85, %cst_60 [2] : vector<2x8x8xf32> to vector<2x8xf32>
    %87 = vector.shape_cast %86 : vector<2x8xf32> to vector<2x8x1xf32>
    %88 = vector.broadcast %87 : vector<2x8x1xf32> to vector<2x8x8xf32>
    %89 = arith.subf %85, %88 : vector<2x8x8xf32>
    %90 = math.exp %89 : vector<2x8x8xf32>
    %cst_61 = arith.constant dense<0.000000e+00> : vector<2x8xf32>
    %91 = vector.multi_reduction <add>, %90, %cst_61 [2] : vector<2x8x8xf32> to vector<2x8xf32>
    %92 = vector.shape_cast %91 : vector<2x8xf32> to vector<2x8x1xf32>
    %93 = tpu.reciprocal %92 {approx = true} : vector<2x8x1xf32> -> vector<2x8x1xf32>
    %94 = vector.broadcast %93 : vector<2x8x1xf32> to vector<2x8x8xf32>
    %95 = arith.mulf %90, %94 : vector<2x8x8xf32>
    "tpu.trace_start"() <{level = 10 : i32, message = "bqk,bkd->bqd"}> : () -> ()
    %cst_62 = arith.constant dense<0.000000e+00> : vector<2x8x8xf32>
    %96 = tpu.matmul %95, %83, %cst_62 {dimension_numbers = #tpu.dot_dimension_numbers<[2], [1], [1], [2], [0, 0, 0, 1, 1, 2], [0], [0]>} : vector<2x8x8xf32>, vector<2x8x8xf32>, vector<2x8x8xf32> -> vector<2x8x8xf32>
    "tpu.trace_stop"() : () -> ()
    %97 = vector.shape_cast %96 : vector<2x8x8xf32> to vector<16x8xf32>
    %c0_63 = arith.constant 0 : index
    %c2 = arith.constant 2 : index
    %c0_64 = arith.constant 0 : index
    %c0_65 = arith.constant 0 : index
    %98 = vector.load %arg7[%c0_63, %c2, %c0_64, %c0_65] : memref<1x4x8x32xf32, #tpu.memory_space<vmem>>, vector<1x1x8x32xf32>
    %99 = vector.shape_cast %98 : vector<1x1x8x32xf32> to vector<8x32xf32>
    %cst_66 = arith.constant dense<0.000000e+00> : vector<16x32xf32>
    %100 = tpu.matmul %97, %99, %cst_66 {dimension_numbers = #tpu.dot_dimension_numbers<[1], [0], [0], [1], [0, 0, 1, 1], [], []>} : vector<16x8xf32>, vector<8x32xf32>, vector<16x32xf32> -> vector<16x32xf32>
    %101 = arith.addf %70, %100 : vector<16x32xf32>
    %102 = vector.extract_strided_slice %4 {offsets = [0, 24], sizes = [16, 8], strides = [1, 1]} : vector<16x32xf32> to vector<16x8xf32>
    %c0_67 = arith.constant 0 : index
    %c0_68 = arith.constant 0 : index
    %c0_69 = arith.constant 0 : index
    %103 = vector.load %arg4[%c0_67, %c0_68, %c0_69] : memref<1x8x8xf32, #tpu.memory_space<vmem>>, vector<1x8x8xf32>
    %104 = vector.shape_cast %103 : vector<1x8x8xf32> to vector<8x8xf32>
    %cst_70 = arith.constant dense<0.000000e+00> : vector<16x8xf32>
    %105 = tpu.matmul %102, %104, %cst_70 {dimension_numbers = #tpu.dot_dimension_numbers<[1], [0], [0], [1], [0, 0, 1, 1], [], []>} : vector<16x8xf32>, vector<8x8xf32>, vector<16x8xf32> -> vector<16x8xf32>
    %c0_71 = arith.constant 0 : index
    %c0_72 = arith.constant 0 : index
    %c0_73 = arith.constant 0 : index
    %106 = vector.load %arg5[%c0_71, %c0_72, %c0_73] : memref<1x8x8xf32, #tpu.memory_space<vmem>>, vector<1x8x8xf32>
    %107 = vector.shape_cast %106 : vector<1x8x8xf32> to vector<8x8xf32>
    %cst_74 = arith.constant dense<0.000000e+00> : vector<16x8xf32>
    %108 = tpu.matmul %102, %107, %cst_74 {dimension_numbers = #tpu.dot_dimension_numbers<[1], [0], [0], [1], [0, 0, 1, 1], [], []>} : vector<16x8xf32>, vector<8x8xf32>, vector<16x8xf32> -> vector<16x8xf32>
    %c0_75 = arith.constant 0 : index
    %c0_76 = arith.constant 0 : index
    %c0_77 = arith.constant 0 : index
    %109 = vector.load %arg6[%c0_75, %c0_76, %c0_77] : memref<1x8x8xf32, #tpu.memory_space<vmem>>, vector<1x8x8xf32>
    %110 = vector.shape_cast %109 : vector<1x8x8xf32> to vector<8x8xf32>
    %cst_78 = arith.constant dense<0.000000e+00> : vector<16x8xf32>
    %111 = tpu.matmul %102, %110, %cst_78 {dimension_numbers = #tpu.dot_dimension_numbers<[1], [0], [0], [1], [0, 0, 1, 1], [], []>} : vector<16x8xf32>, vector<8x8xf32>, vector<16x8xf32> -> vector<16x8xf32>
    %112 = vector.shape_cast %105 : vector<16x8xf32> to vector<2x8x8xf32>
    %113 = vector.shape_cast %108 : vector<16x8xf32> to vector<2x8x8xf32>
    %114 = vector.shape_cast %111 : vector<16x8xf32> to vector<2x8x8xf32>
    "tpu.trace_start"() <{level = 10 : i32, message = "bqd,bkd->bqk"}> : () -> ()
    %cst_79 = arith.constant dense<0.000000e+00> : vector<2x8x8xf32>
    %115 = tpu.matmul %112, %113, %cst_79 {dimension_numbers = #tpu.dot_dimension_numbers<[2], [2], [1], [1], [0, 0, 0, 1, 1, 1], [0], [0]>} : vector<2x8x8xf32>, vector<2x8x8xf32>, vector<2x8x8xf32> -> vector<2x8x8xf32>
    "tpu.trace_stop"() : () -> ()
    %116 = arith.addf %115, %7 : vector<2x8x8xf32>
    %cst_80 = arith.constant dense<0xFF800000> : vector<2x8xf32>
    %117 = vector.multi_reduction <maximumf>, %116, %cst_80 [2] : vector<2x8x8xf32> to vector<2x8xf32>
    %118 = vector.shape_cast %117 : vector<2x8xf32> to vector<2x8x1xf32>
    %119 = vector.broadcast %118 : vector<2x8x1xf32> to vector<2x8x8xf32>
    %120 = arith.subf %116, %119 : vector<2x8x8xf32>
    %121 = math.exp %120 : vector<2x8x8xf32>
    %cst_81 = arith.constant dense<0.000000e+00> : vector<2x8xf32>
    %122 = vector.multi_reduction <add>, %121, %cst_81 [2] : vector<2x8x8xf32> to vector<2x8xf32>
    %123 = vector.shape_cast %122 : vector<2x8xf32> to vector<2x8x1xf32>
    %124 = tpu.reciprocal %123 {approx = true} : vector<2x8x1xf32> -> vector<2x8x1xf32>
    %125 = vector.broadcast %124 : vector<2x8x1xf32> to vector<2x8x8xf32>
    %126 = arith.mulf %121, %125 : vector<2x8x8xf32>
    "tpu.trace_start"() <{level = 10 : i32, message = "bqk,bkd->bqd"}> : () -> ()
    %cst_82 = arith.constant dense<0.000000e+00> : vector<2x8x8xf32>
    %127 = tpu.matmul %126, %114, %cst_82 {dimension_numbers = #tpu.dot_dimension_numbers<[2], [1], [1], [2], [0, 0, 0, 1, 1, 2], [0], [0]>} : vector<2x8x8xf32>, vector<2x8x8xf32>, vector<2x8x8xf32> -> vector<2x8x8xf32>
    "tpu.trace_stop"() : () -> ()
    %128 = vector.shape_cast %127 : vector<2x8x8xf32> to vector<16x8xf32>
    %c0_83 = arith.constant 0 : index
    %c3 = arith.constant 3 : index
    %c0_84 = arith.constant 0 : index
    %c0_85 = arith.constant 0 : index
    %129 = vector.load %arg7[%c0_83, %c3, %c0_84, %c0_85] : memref<1x4x8x32xf32, #tpu.memory_space<vmem>>, vector<1x1x8x32xf32>
    %130 = vector.shape_cast %129 : vector<1x1x8x32xf32> to vector<8x32xf32>
    %cst_86 = arith.constant dense<0.000000e+00> : vector<16x32xf32>
    %131 = tpu.matmul %128, %130, %cst_86 {dimension_numbers = #tpu.dot_dimension_numbers<[1], [0], [0], [1], [0, 0, 1, 1], [], []>} : vector<16x8xf32>, vector<8x32xf32>, vector<16x32xf32> -> vector<16x32xf32>
    %132 = arith.addf %101, %131 : vector<16x32xf32>
    %c0_87 = arith.constant 0 : index
    %c0_88 = arith.constant 0 : index
    %c0_89 = arith.constant 0 : index
    %133 = vector.load %arg8[%c0_87, %c0_88, %c0_89] : memref<1x1x32xf32, #tpu.memory_space<vmem>>, vector<1x1x32xf32>
    %134 = vector.shape_cast %133 : vector<1x1x32xf32> to vector<1x32xf32>
    %135 = vector.broadcast %134 : vector<1x32xf32> to vector<16x32xf32>
    %136 = arith.addf %132, %135 : vector<16x32xf32>
    %137 = arith.addf %136, %4 : vector<16x32xf32>
    %c0_90 = arith.constant 0 : index
    %c0_91 = arith.constant 0 : index
    %c0_92 = arith.constant 0 : index
    %138 = vector.load %arg9[%c0_90, %c0_91, %c0_92] : memref<1x1x32xf32, #tpu.memory_space<vmem>>, vector<1x1x32xf32>
    %139 = vector.shape_cast %138 : vector<1x1x32xf32> to vector<1x32xf32>
    %c0_93 = arith.constant 0 : index
    %c0_94 = arith.constant 0 : index
    %c0_95 = arith.constant 0 : index
    %140 = vector.load %arg10[%c0_93, %c0_94, %c0_95] : memref<1x1x32xf32, #tpu.memory_space<vmem>>, vector<1x1x32xf32>
    %141 = vector.shape_cast %140 : vector<1x1x32xf32> to vector<1x32xf32>
    %cst_96 = arith.constant dense<0.000000e+00> : vector<16xf32>
    %142 = vector.multi_reduction <add>, %137, %cst_96 [1] : vector<16x32xf32> to vector<16xf32>
    %143 = vector.shape_cast %142 : vector<16xf32> to vector<16x1xf32>
    %cst_97 = arith.constant 3.200000e+01 : f32
    %144 = vector.broadcast %cst_97 : f32 to vector<16x1xf32>
    %145 = arith.divf %143, %144 : vector<16x1xf32>
    %146 = vector.broadcast %145 : vector<16x1xf32> to vector<16x32xf32>
    %147 = arith.subf %137, %146 : vector<16x32xf32>
    %148 = arith.mulf %147, %147 : vector<16x32xf32>
    %cst_98 = arith.constant dense<0.000000e+00> : vector<16xf32>
    %149 = vector.multi_reduction <add>, %148, %cst_98 [1] : vector<16x32xf32> to vector<16xf32>
    %150 = vector.shape_cast %149 : vector<16xf32> to vector<16x1xf32>
    %cst_99 = arith.constant 3.200000e+01 : f32
    %151 = vector.broadcast %cst_99 : f32 to vector<16x1xf32>
    %152 = arith.divf %150, %151 : vector<16x1xf32>
    %153 = vector.broadcast %145 : vector<16x1xf32> to vector<16x32xf32>
    %154 = arith.subf %137, %153 : vector<16x32xf32>
    %cst_100 = arith.constant 9.99999974E-6 : f32
    %155 = vector.broadcast %cst_100 : f32 to vector<16x1xf32>
    %156 = arith.addf %152, %155 : vector<16x1xf32>
    %157 = math.rsqrt %156 : vector<16x1xf32>
    %158 = vector.broadcast %157 : vector<16x1xf32> to vector<16x32xf32>
    %159 = arith.mulf %154, %158 : vector<16x32xf32>
    %160 = vector.broadcast %139 : vector<1x32xf32> to vector<16x32xf32>
    %161 = arith.mulf %159, %160 : vector<16x32xf32>
    %162 = vector.broadcast %141 : vector<1x32xf32> to vector<16x32xf32>
    %163 = arith.addf %161, %162 : vector<16x32xf32>
    %c0_101 = arith.constant 0 : index
    %c0_102 = arith.constant 0 : index
    %c0_103 = arith.constant 0 : index
    %164 = vector.load %arg11[%c0_101, %c0_102, %c0_103] : memref<1x32x64xf32, #tpu.memory_space<vmem>>, vector<1x32x64xf32>
    %165 = vector.shape_cast %164 : vector<1x32x64xf32> to vector<32x64xf32>
    %cst_104 = arith.constant dense<0.000000e+00> : vector<16x64xf32>
    %166 = tpu.matmul %163, %165, %cst_104 {dimension_numbers = #tpu.dot_dimension_numbers<[1], [0], [0], [1], [0, 0, 1, 1], [], []>} : vector<16x32xf32>, vector<32x64xf32>, vector<16x64xf32> -> vector<16x64xf32>
    %c0_105 = arith.constant 0 : index
    %c0_106 = arith.constant 0 : index
    %c0_107 = arith.constant 0 : index
    %167 = vector.load %arg12[%c0_105, %c0_106, %c0_107] : memref<1x1x64xf32, #tpu.memory_space<vmem>>, vector<1x1x64xf32>
    %168 = vector.shape_cast %167 : vector<1x1x64xf32> to vector<1x64xf32>
    %169 = vector.broadcast %168 : vector<1x64xf32> to vector<16x64xf32>
    %170 = arith.addf %166, %169 : vector<16x64xf32>
    %cst_108 = arith.constant 0.000000e+00 : f32
    %171 = vector.broadcast %cst_108 : f32 to vector<16x64xf32>
    %172 = arith.maximumf %170, %171 : vector<16x64xf32>
    %c0_109 = arith.constant 0 : index
    %c0_110 = arith.constant 0 : index
    %c0_111 = arith.constant 0 : index
    %173 = vector.load %arg13[%c0_109, %c0_110, %c0_111] : memref<1x64x32xf32, #tpu.memory_space<vmem>>, vector<1x64x32xf32>
    %174 = vector.shape_cast %173 : vector<1x64x32xf32> to vector<64x32xf32>
    %cst_112 = arith.constant dense<0.000000e+00> : vector<16x32xf32>
    %175 = tpu.matmul %172, %174, %cst_112 {dimension_numbers = #tpu.dot_dimension_numbers<[1], [0], [0], [1], [0, 0, 1, 1], [], []>} : vector<16x64xf32>, vector<64x32xf32>, vector<16x32xf32> -> vector<16x32xf32>
    %c0_113 = arith.constant 0 : index
    %c0_114 = arith.constant 0 : index
    %c0_115 = arith.constant 0 : index
    %176 = vector.load %arg14[%c0_113, %c0_114, %c0_115] : memref<1x1x32xf32, #tpu.memory_space<vmem>>, vector<1x1x32xf32>
    %177 = vector.shape_cast %176 : vector<1x1x32xf32> to vector<1x32xf32>
    %178 = vector.broadcast %177 : vector<1x32xf32> to vector<16x32xf32>
    %179 = arith.addf %175, %178 : vector<16x32xf32>
    %180 = arith.addf %179, %163 : vector<16x32xf32>
    %c0_116 = arith.constant 0 : index
    %c0_117 = arith.constant 0 : index
    %c0_118 = arith.constant 0 : index
    %181 = vector.load %arg15[%c0_116, %c0_117, %c0_118] : memref<1x1x32xf32, #tpu.memory_space<vmem>>, vector<1x1x32xf32>
    %182 = vector.shape_cast %181 : vector<1x1x32xf32> to vector<1x32xf32>
    %c0_119 = arith.constant 0 : index
    %c0_120 = arith.constant 0 : index
    %c0_121 = arith.constant 0 : index
    %183 = vector.load %arg16[%c0_119, %c0_120, %c0_121] : memref<1x1x32xf32, #tpu.memory_space<vmem>>, vector<1x1x32xf32>
    %184 = vector.shape_cast %183 : vector<1x1x32xf32> to vector<1x32xf32>
    %cst_122 = arith.constant dense<0.000000e+00> : vector<16xf32>
    %185 = vector.multi_reduction <add>, %180, %cst_122 [1] : vector<16x32xf32> to vector<16xf32>
    %186 = vector.shape_cast %185 : vector<16xf32> to vector<16x1xf32>
    %cst_123 = arith.constant 3.200000e+01 : f32
    %187 = vector.broadcast %cst_123 : f32 to vector<16x1xf32>
    %188 = arith.divf %186, %187 : vector<16x1xf32>
    %189 = vector.broadcast %188 : vector<16x1xf32> to vector<16x32xf32>
    %190 = arith.subf %180, %189 : vector<16x32xf32>
    %191 = arith.mulf %190, %190 : vector<16x32xf32>
    %cst_124 = arith.constant dense<0.000000e+00> : vector<16xf32>
    %192 = vector.multi_reduction <add>, %191, %cst_124 [1] : vector<16x32xf32> to vector<16xf32>
    %193 = vector.shape_cast %192 : vector<16xf32> to vector<16x1xf32>
    %cst_125 = arith.constant 3.200000e+01 : f32
    %194 = vector.broadcast %cst_125 : f32 to vector<16x1xf32>
    %195 = arith.divf %193, %194 : vector<16x1xf32>
    %196 = vector.broadcast %188 : vector<16x1xf32> to vector<16x32xf32>
    %197 = arith.subf %180, %196 : vector<16x32xf32>
    %cst_126 = arith.constant 9.99999974E-6 : f32
    %198 = vector.broadcast %cst_126 : f32 to vector<16x1xf32>
    %199 = arith.addf %195, %198 : vector<16x1xf32>
    %200 = math.rsqrt %199 : vector<16x1xf32>
    %201 = vector.broadcast %200 : vector<16x1xf32> to vector<16x32xf32>
    %202 = arith.mulf %197, %201 : vector<16x32xf32>
    %203 = vector.broadcast %182 : vector<1x32xf32> to vector<16x32xf32>
    %204 = arith.mulf %202, %203 : vector<16x32xf32>
    %205 = vector.broadcast %184 : vector<1x32xf32> to vector<16x32xf32>
    %206 = arith.addf %204, %205 : vector<16x32xf32>
    %207 = vector.shape_cast %206 : vector<16x32xf32> to vector<2x8x32xf32>
    %c0_127 = arith.constant 0 : index
    %c0_128 = arith.constant 0 : index
    %c0_129 = arith.constant 0 : index
    %208 = vector.load %arg17[%c0_127, %c0_128, %c0_129] : memref<2x8x32xf32, #tpu.memory_space<vmem>>, vector<2x8x32xf32>
    tpu.vector_store %arg17[%c0_127, %c0_128, %c0_129], %207 {strides = array<i32>} : memref<2x8x32xf32, #tpu.memory_space<vmem>>, vector<2x8x32xf32>,
    return
  }
  func.func @transform_0(%arg0: i32, %arg1: i32) -> (i32, i32, i32) {
    %c0_i32 = arith.constant 0 : i32
    %c0_i32_0 = arith.constant 0 : i32
    %c0_i32_1 = arith.constant 0 : i32
    return %arg0, %c0_i32, %c0_i32_0 : i32, i32, i32
  }
  func.func @transform_1(%arg0: i32, %arg1: i32) -> (i32, i32, i32) {
    %c0_i32 = arith.constant 0 : i32
    %c0_i32_0 = arith.constant 0 : i32
    %c0_i32_1 = arith.constant 0 : i32
    return %arg0, %c0_i32, %c0_i32_0 : i32, i32, i32
  }
  func.func @transform_2(%arg0: i32, %arg1: i32) -> (i32, i32, i32) {
    %c0_i32 = arith.constant 0 : i32
    %c0_i32_0 = arith.constant 0 : i32
    %c0_i32_1 = arith.constant 0 : i32
    return %arg1, %c0_i32, %c0_i32_0 : i32, i32, i32
  }
  func.func @transform_3(%arg0: i32, %arg1: i32) -> (i32, i32, i32) {
    %c0_i32 = arith.constant 0 : i32
    %c0_i32_0 = arith.constant 0 : i32
    %c0_i32_1 = arith.constant 0 : i32
    return %arg1, %c0_i32, %c0_i32_0 : i32, i32, i32
  }
  func.func @transform_4(%arg0: i32, %arg1: i32) -> (i32, i32, i32) {
    %c0_i32 = arith.constant 0 : i32
    %c0_i32_0 = arith.constant 0 : i32
    %c0_i32_1 = arith.constant 0 : i32
    return %arg1, %c0_i32, %c0_i32_0 : i32, i32, i32
  }
  func.func @transform_5(%arg0: i32, %arg1: i32) -> (i32, i32, i32, i32) {
    %c0_i32 = arith.constant 0 : i32
    %c0_i32_0 = arith.constant 0 : i32
    %c0_i32_1 = arith.constant 0 : i32
    %c0_i32_2 = arith.constant 0 : i32
    return %arg1, %c0_i32, %c0_i32_0, %c0_i32_1 : i32, i32, i32, i32
  }
  func.func @transform_6(%arg0: i32, %arg1: i32) -> (i32, i32, i32) {
    %c0_i32 = arith.constant 0 : i32
    %c0_i32_0 = arith.constant 0 : i32
    %c0_i32_1 = arith.constant 0 : i32
    return %arg1, %c0_i32, %c0_i32_0 : i32, i32, i32
  }
  func.func @transform_7(%arg0: i32, %arg1: i32) -> (i32, i32, i32) {
    %c0_i32 = arith.constant 0 : i32
    %c0_i32_0 = arith.constant 0 : i32
    %c0_i32_1 = arith.constant 0 : i32
    return %arg1, %c0_i32, %c0_i32_0 : i32, i32, i32
  }
  func.func @transform_8(%arg0: i32, %arg1: i32) -> (i32, i32, i32) {
    %c0_i32 = arith.constant 0 : i32
    %c0_i32_0 = arith.constant 0 : i32
    %c0_i32_1 = arith.constant 0 : i32
    return %arg1, %c0_i32, %c0_i32_0 : i32, i32, i32
  }
  func.func @transform_9(%arg0: i32, %arg1: i32) -> (i32, i32, i32) {
    %c0_i32 = arith.constant 0 : i32
    %c0_i32_0 = arith.constant 0 : i32
    %c0_i32_1 = arith.constant 0 : i32
    return %arg1, %c0_i32, %c0_i32_0 : i32, i32, i32
  }
  func.func @transform_10(%arg0: i32, %arg1: i32) -> (i32, i32, i32) {
    %c0_i32 = arith.constant 0 : i32
    %c0_i32_0 = arith.constant 0 : i32
    %c0_i32_1 = arith.constant 0 : i32
    return %arg1, %c0_i32, %c0_i32_0 : i32, i32, i32
  }
  func.func @transform_11(%arg0: i32, %arg1: i32) -> (i32, i32, i32) {
    %c0_i32 = arith.constant 0 : i32
    %c0_i32_0 = arith.constant 0 : i32
    %c0_i32_1 = arith.constant 0 : i32
    return %arg1, %c0_i32, %c0_i32_0 : i32, i32, i32
  }
  func.func @transform_12(%arg0: i32, %arg1: i32) -> (i32, i32, i32) {
    %c0_i32 = arith.constant 0 : i32
    %c0_i32_0 = arith.constant 0 : i32
    %c0_i32_1 = arith.constant 0 : i32
    return %arg1, %c0_i32, %c0_i32_0 : i32, i32, i32
  }
  func.func @transform_13(%arg0: i32, %arg1: i32) -> (i32, i32, i32) {
    %c0_i32 = arith.constant 0 : i32
    %c0_i32_0 = arith.constant 0 : i32
    %c0_i32_1 = arith.constant 0 : i32
    return %arg1, %c0_i32, %c0_i32_0 : i32, i32, i32
  }
  func.func @transform_14(%arg0: i32, %arg1: i32) -> (i32, i32, i32) {
    %c0_i32 = arith.constant 0 : i32
    %c0_i32_0 = arith.constant 0 : i32
    %c0_i32_1 = arith.constant 0 : i32
    return %arg1, %c0_i32, %c0_i32_0 : i32, i32, i32
  }
  func.func @transform_15(%arg0: i32, %arg1: i32) -> (i32, i32, i32) {
    %c0_i32 = arith.constant 0 : i32
    %c0_i32_0 = arith.constant 0 : i32
    %c0_i32_1 = arith.constant 0 : i32
    return %arg0, %c0_i32, %c0_i32_0 : i32, i32, i32
  }
}

</mosaic_0001>

<bundles_post_ra>
// kernel: tpu_custom_call.1
= control target key start
LH: loop header
LB: loop body
LE: loop exit
PB: predicated region body
PF: predicated region fallthrough
CT: control target
= control target key end

     0   :  { %s3052_s0 = inlined_call_operand.hbm [shape: f32[2,1,8], index: 0, kind: input, shape index: {}]   ;;  %s3053_s1 = inlined_call_operand.vmem [shape: f32[2,8,32], index: 1, kind: input, shape index: {}]   ;;  %s3054_s2 = inlined_call_operand.vmem [shape: f32[2,8,8], index: 2, kind: input, shape index: {}]   ;;  %s3055_s3 = inlined_call_operand.vmem [shape: f32[2,8,8], index: 3, kind: input, shape index: {}]   ;;  %s3056_s4 = inlined_call_operand.vmem [shape: f32[2,8,8], index: 4, kind: input, shape index: {}]   ;;  %s3057_s5 = inlined_call_operand.vmem [shape: f32[2,4,8,32], index: 5, kind: input, shape index: {}]   ;;  %s3058_s6 = inlined_call_operand.vmem [shape: f32[2,1,32], index: 6, kind: input, shape index: {}]   ;;  %s3059_s7 = inlined_call_operand.vmem [shape: f32[2,1,32], index: 7, kind: input, shape index: {}]   ;;  %s3060_s8 = inlined_call_operand.hbm [shape: f32[2,1,32], index: 8, kind: input, shape index: {}]   ;;  %s3061_s9 = inlined_call_operand.vmem [shape: f32[2,32,64], index: 9, kind: input, shape index: {}]   ;;  %s3062_s10 = inlined_call_operand.vmem [shape: f32[2,1,64], index: 10, kind: input, shape index: {}]   ;;  %s3063_s11 = inlined_call_operand.vmem [shape: f32[2,64,32], index: 11, kind: input, shape index: {}]   ;;  %s3064_s12 = inlined_call_operand.vmem [shape: f32[2,1,32], index: 12, kind: input, shape index: {}]   ;;  %s3065_s13 = inlined_call_operand.vmem [shape: f32[2,1,32], index: 13, kind: input, shape index: {}]   ;;  %s3066_s14 = inlined_call_operand.hbm [shape: f32[2,1,32], index: 14, kind: input, shape index: {}]   ;;  %s3067_s15 = inlined_call_operand.hbm [shape: f32[2,8,32], index: 15, kind: output, shape index: {}]  }
   0x1   :  { %3075 = sst [smem:[#allocation20_spill]] %s3052_s0 }
   0x2   :  { %3076 = sst [smem:[#allocation21_spill]] %s3053_s1 }
   0x3   :  { %3077 = sst [smem:[#allocation22_spill]] %s3054_s2 }
   0x4   :  { %3078 = sst [smem:[#allocation23_spill]] %s3055_s3 }
   0x5   :  { %3079 = sst [smem:[#allocation24_spill]] %s3057_s5 }
   0x6   :  { %3080 = sst [smem:[#allocation25_spill]] %s3060_s8 }
   0x7   :  { %3081 = sst [smem:[#allocation26_spill]] %s3063_s11 }
   0x8   :  { %3082 = sst [smem:[#allocation27_spill]] %s3065_s13 }
   0x9   :  { %3083 = sst [smem:[#allocation28_spill]] %s3066_s14 }
   0xa   :  { %3084 = sst [smem:[#allocation29_spill]] %s3067_s15 }
   0xb   :  { %20 = vsyncpa [#allocation3], 0 }
   0xc   :  { %21 = vsyncpa [#allocation6], 0 }
   0xd   :  { %23 = vsyncpa [#allocation6 + $0x1], 0 }
   0xe   :  { %24 = vsyncpa [#allocation4], 0  ;;  %s2657_s18 = smov 0   ;;  %s2659_s19 = smov 0  }
   0xf   :  { %s2661_s20 = smov 0   ;;  %s2663_s21 = smov 0  }
  0x10   :  { %s2665_s22 = smov 0   ;;  %s2667_s23 = smov 0  }
  0x11 LB: > { %3085 = sst [smem:[#allocation12_spill]] %s2549_s19  ;;  %s39_s24 = sadd.s32 1, %s2561_s22  ;;  %s2565_s23 = sphi %s2667_s23, %s30_s23   ;;  %s2561_s22 = sphi %s2665_s22, %s3118_s22   ;;  %s2557_s21 = sphi %s2663_s21, %s3117_s21   ;;  %s2553_s20 = sphi %s2661_s20, %s3116_s20   ;;  %s2549_s19 = sphi %s2659_s19, %s3115_s19   ;;  %s2545_s18 = sphi %s2657_s18, %s3114_s18  }
  0x12   : > { %3086 = sst [smem:[#allocation13_spill]] %s2553_s20  ;;  %s257_s25 = sadd.s32 1, %s2553_s20 }
  0x13   : > { %3087 = sst [smem:[#allocation14_spill]] %s2561_s22  ;;  %p40_p0 = scmp.ge.s32.totalorder %s39_s24, 2 }
  0x14   : > { %3088 = sst [smem:[#allocation15_spill]] %s2565_s23  ;;  %p264_p1 = scmp.ne.s32.totalorder %s2553_s20, %s2549_s19 }
  0x15   : > { %p265_p2 = scmp.eq.s32.totalorder %s2565_s23, 0  ;;  %p270_p3 = scmp.ne.s32.totalorder %s2549_s19, %s2545_s18 }
  0x16   : > { %s3120_s24 = smov (%p40_p0, %s39_s24), 0  ;;  %p2276_p5 = scmp.lt.s32.totalorder %s2565_s23, 2 }
  0x17   : > { %3089 = sst [smem:[#allocation16_spill]] %s3120_s24  ;;  %p2696_p4 = por %p265_p2, %p264_p1 }
  0x18   : > { %s254_s27 = ssub.s32 %s2561_s22, %s3120_s24  ;;  %s542_s28 = sand.u32 1, %s2565_s23  }
  0x19   : > { %p255_p6 = scmp.eq.s32.totalorder %s254_s27, 0  ;;  %s544_s29 = sand.u32 1, %s2553_s20  }
  0x1a   : > { %s3092_s8 = sld [smem:[#allocation25_spill]]  ;;  %s545_s13 = scalar_lea.vmem [#allocation5], %s544_s29 }
  0x1b   : > { %s2706_s30 = scalar_select %p255_p6, %s2553_s20, %s257_s25  }
  0x1c   : > { %s552_s11 = sshll.u32 %s545_s13, 4  ;;  %p2714_p7 = pnand %p2276_p5, %p2696_p4  ;;  %s553_s11 = int_to_ptr.vmem [resolvable:$true] %s552_s11 }
  0x1d   : > { %3091 = sst [smem:[#allocation17_spill]] %s2706_s30  ;;  %s2719_s27 = sadd.s32 4294967295, %s2565_s23  }
  0x1e   : > { %3094 = sst [smem:[#allocation18_spill]] %s2719_s27  ;;  %s543_s25 = scalar_lea.sflag [#allocation6], %s542_s28 }
  0x1f   : > { %p271_p8 = scmp.eq.s32.totalorder %s2719_s27, 0  ;;  %p2166_p9 = scmp.ge.s32.totalorder %s2565_s23, 1 }
  0x20   : > { %s548_s15 = scalar_lea.hbm %s3092_s8, %s2561_s22  ;;  %p463_p10 = scmp.lt.s32.totalorder %s2565_s23, 3 }
  0x21   : > { %s550_s1 = sshll.u32 %s548_s15, 4  ;;  %p2731_p11 = por %p271_p8, %p270_p3  ;;  %s551_s1 = int_to_ptr.hbm [resolvable:$true] %s550_s1 }
  0x22   : > { %2271 = dma.hbm_to_vmem [thread:$0]  (!%p2714_p7), %s551_s1, 16, %s553_s11, %s543_s25  }
  0x23   : > { %s3096_s0 = sld [smem:[#allocation20_spill]]  ;;  %p2738_p12 = pnand %p2166_p9, %p463_p10 }
  0x24   : > { %s2567_s1 = smov [#allocation2]   ;;  %s3098_s14 = sld [smem:[#allocation28_spill]] }
  0x25   : > { %p2264_p13 = pneg %p2738_p12  ;;  %s478_s11 = sshll.u32 %s2567_s1, 4  ;;  %s479_s11 = int_to_ptr.vmem [resolvable:$true] %s478_s11 }
  0x26   : > { %s596_s26 = scalar_lea.vmem [#allocation7], %s544_s29  ;;  %s2568_s30 = smov 16  }
  0x27   : > { %p2265_p0 = pnand %p2264_p13, %p271_p8  ;;  %s2569_s20 = smov 1  }
  0x29   : > { %s476_s16 = sshll.u32 %s3096_s0, 4  ;;  %s603_s0 = sshll.u32 %s596_s26, 4  ;;  %s477_s16 = int_to_ptr.hbm [resolvable:$true] %s476_s16  ;;  %s604_s0 = int_to_ptr.vmem [resolvable:$true] %s603_s0 }
  0x2a   : > { %s599_s8 = scalar_lea.hbm %s3098_s14, %s2561_s22  ;;  %612 = sbr.rel (%p2738_p12) target bundleno = 3148 (0xc4c), region = 80 }
  0x2b   : > { %s601_s15 = sshll.u32 %s599_s8, 4  ;;  %s602_s15 = int_to_ptr.hbm [resolvable:$true] %s601_s15 }
  0x2c   : > { %2267 = dma.hbm_to_vmem [thread:$0]  (!%p2265_p0), %s477_s16, 32, %s479_s11, [#allocation3], %s2568_s30, %s2568_s30, %s2569_s20  }
  0x2d   : > { %2274 = dma.hbm_to_vmem [thread:$0]  (!%p2714_p7), %s602_s15, 16, %s604_s0, %s543_s25  }
  0x2f   : > { %2532 = dma.done.wait (%p271_p8), [#allocation3], 32  }
  0x30   : > { %2534 = vsyncadd (%p271_p8), [#allocation3], 4294967264  ;;  %s619_s8 = sand.u32 1, %s2719_s27   ;;  %s621_s29 = sand.u32 1, %s2549_s19  }
  0x31   : > { %s620_s1 = scalar_lea.sflag [#allocation6], %s619_s8  ;;  %s2760_s18 = scalar_lea.vmem [#allocation5], %s621_s29 }
  0x32   : > { %3099 = sst [smem:[#allocation19_spill]] %s2760_s18 }
  0x33   : > { %2536 = dma.done.wait (%p2731_p11), %s620_s1, 32  }
  0x34   : > { %2538 = vsyncadd (%p2731_p11), %s620_s1, 4294967264  ;;  %p731_p1 = scmp.lt.s32.totalorder %s2557_s21, 1  ;;  %s3100_s2 = sld [smem:[#allocation22_spill]] }
  0x35   : > { %s3101_s3 = sld [smem:[#allocation23_spill]]  ;;  %p2181_p2 = scmp.ne.s32.totalorder %s2557_s21, 0 }
  0x36   : > { %s2768_s0 = scalar_select %p731_p1, %s2557_s21, 1 }
  0x37   : > { %s3102_s5 = sld [smem:[#allocation24_spill]] }
  0x38   : > { %s2771_s20 = sshll.u32 %s2768_s0, 3  ;;  %s2249_s24 = sshll.u32 %s2768_s0, 5 }
  0x39   : > { %s2802_s17 = scalar_lea.vmem %s3061_s9, %s2249_s24  ;;  %s761_s26 = scalar_lea.vmem %s3062_s10, %s2768_s0 }
  0x3a   : > { %s734_s13 = scalar_lea.vmem %s3100_s2, %s2771_s20  ;;  %s2251_s8 = sshll.u32 %s2768_s0, 6 }
  0x3b   : > { %s738_s11 = scalar_lea.vmem %s3101_s3, %s2771_s20  ;;  %s3103_s23 = sld [smem:[#allocation26_spill]] }
  0x3c   : > { %s3104_s25 = sld [smem:[#allocation27_spill]] }
  0x3d   : > { %s2789_s14 = scalar_lea.vmem %s3102_s5, %s2249_s24  ;;  %s769_s5 = scalar_lea.vmem %s3064_s12, %s2768_s0 }
  0x3e   : > { %s2822_s24 = scalar_lea.vmem [#allocation7], %s621_s29  ;;  %777 = sbr.rel (%p2181_p2) target bundleno = 72 (0x48), region = 96 }
  0x3f   : > { %s3105_s15 = sld [smem:[#allocation21_spill]] (!%p2181_p2) }
  0x41   : > { %s2816_s18 = scalar_lea.vmem %s3103_s23, %s2251_s8 }
  0x42   : > { %s772_s2 = scalar_lea.vmem %s3104_s25, %s2768_s0 }
  0x43   : > { %vm780_vm0 = vcmask 261120  }
  0x45   : > { %v778_v0 = vld [vmem:[%s3105_s15] sm:$0xff]  ;;  %v779_v1 = vld [vmem:[%s3105_s15 + $0x8] sm:$0xff] }
  0x46   : > { %781 = vst.msk [vmem:[#allocation8] sm:$0xff] %vm780_vm0, %v778_v0 }
  0x47   : > { %782 = vst.msk [vmem:[#allocation8 + $0x8] sm:$0xff] %vm780_vm0, %v779_v1 }
  0x48 PF: > { %v2831_v2 = vld [vmem:[%s738_s11] sm:$0xff]  ;;  %vm794_vm1 = vcmask 64512   ;;  %s2570_s21 = smov 120   ;;  %s2572_s11 = smov 104   ;;  %vm1729_vm2 = vcmask 261120   ;;  %vm1842_vm10 = vcmask 523264  }
  0x49   : > { %v2835_v4 = vld [vmem:[%s734_s13] sm:$0xff]  ;;  %840 = vmatpush.msra.mxu1 %v2831_v2  ;;  %s3106_s13 = scalar_lea.vmem %s3056_s4, %s2771_s20  ;;  %s2571_s20 = smov 112  }
  0x4a   : > { %816 = vmatpush.msra.mxu0 %v2835_v4  ;;  %v2856_v10 = vld [vmem:[#allocation2] ss:$0 sm:$0xff]  ;;  %v2860_v14 = vld [vmem:[#allocation2 + $0x1] ss:$0 sm:$0xff]  ;;  %s3107_s19 = scalar_lea.vmem %s3058_s6, %s2768_s0  ;;  %s3109_s27 = scalar_lea.vmem %s3059_s7, %s2768_s0 }
  0x4b   : > { %v2869_v18 = vld [vmem:[%s3106_s13] sm:$0xff]  ;;  %s3111_s1 = sld [smem:[#allocation18_spill]]  ;;  %s2574_s0 = smov [#allocation8]  }
  0x4c   : > { %864 = vmatpush.msra.mxu2 %v2869_v18  ;;  %v992_v43 = vld [vmem:[%s2789_s14] sm:$0xff]  ;;  %s3112_s29 = sld [smem:[#allocation29_spill]]  ;;  %s2575_s13 = smov 128  }
  0x4d   : > { %v2833_v3 = vld [vmem:[#allocation8] sm:$0xff] }
  0x4e   : > { %2184 = vmatmul.msk.f32.vlgmr.msra.gmra.mxu1 %vm794_vm1, %v2833_v3  ;;  %2182 = vmatmul.msk.f32.vlgmr.msra.gmra.mxu0 %vm794_vm1, %v2833_v3  ;;  %v2843_v5 = vld [vmem:[#allocation8 + $0x8] sm:$0xff] }
  0x4f   : > { %994 = vrot.lane.b32.xlu0 %v2833_v3, %s2570_s21  ;;  %2186 = vmatmul.msk.f32.vlgmr.msra.gmra.mxu2 %vm794_vm1, %v2833_v3 }
  0x50   : > { %1017 = vmatpush.msrb.mxu2 %v2835_v4 }
  0x51   : > { %p2278_p3 = scmp.eq.s32.totalorder %s3111_s1, 1 }
  0x56   : > { %2185 = vmatmul.msk.f32.gmra.mxu1 %vm794_vm1, %v2843_v5  ;;  %2183 = vmatmul.msk.f32.gmra.mxu0 %vm794_vm1, %v2843_v5 }
  0x57   : > { %996 = vrot.lane.b32.xlu0 %v2843_v5, %s2570_s21  ;;  %2187 = vmatmul.msk.f32.gmra.mxu2 %vm794_vm1, %v2843_v5 }
  0xc1   : > { %v995_v19 = vpop.permute.xlu0 %994 }
  0xc2   : > { %2194 = vmatmul.msk.f32.vlgmr.msrb.gmra.mxu2 %vm794_vm1, %v995_v19 }
  0xc9   : > { %v997_v20 = vpop.permute.xlu0 %996 }
  0xca   : > { %2195 = vmatmul.msk.f32.gmra.mxu2 %vm794_vm1, %v997_v20 }
  0xcb   : > { %v842_v6 = vpop.f32.mrf.mxu1  ;;  %v818_v7 = vpop.f32.mrf.mxu0 }
  0xcc   : > { %2188 = vmatpush.xpose.msk.msra.mxu3 %vm794_vm1, %v842_v6 }
  0xcf   : > { %2189 = vmatmul.msk.f32.vlgmr.msra.gmra.mxu3 %vm794_vm1, %v818_v7 }
  0xd2   : > { %v866_v31 = vpop.f32.mrf.mxu2 }
  0xd3   : > { %v845_v8 = vpop.f32.mrf.mxu1  ;;  %v821_v9 = vpop.f32.mrf.mxu0  ;;  %964 = vmatpush.msrb.mxu0 %v866_v31 }
  0xd4   : > { %2190 = vmatpush.xpose.msk.msrb.mxu3 %vm794_vm1, %v845_v8 }
  0xd5   : > { %1065 = vmatpush.msra.mxu0 %v2869_v18 }
  0xd7   : > { %2191 = vmatmul.msk.f32.vlgmr.msrb.gmra.mxu3 %vm794_vm1, %v821_v9 }
  0xd8   : > { %1041 = vmatpush.msra.mxu3 %v2831_v2 }
  0xda   : > { %v869_v32 = vpop.f32.mrf.mxu2 }
  0xdb   : > { %987 = vmatpush.msrb.mxu1 %v869_v32 }
  0xdf   : > { %2196 = vmatmul.msk.f32.vlgmr.msra.gmra.mxu3 %vm794_vm1, %v995_v19 }
  0xe7   : > { %2197 = vmatmul.msk.f32.gmra.mxu3 %vm794_vm1, %v997_v20 }
 0x145   : > { %v1019_v41 = vpop.f32.mrf.mxu2 }
 0x14d   : > { %v1022_v42 = vpop.f32.mrf.mxu2 }
 0x152   : > { %v895_v11 = vpop.f32.mrf.mxu3 }
 0x153   : > { %v896_v12 = vadd.f32 %v2856_v10, %v895_v11 }
 0x155   : > { %v924_v13 = vsel %vm794_vm1, %v896_v12, -inf }
 0x156   : > { %925 = vmax.xlane.f32.xlu2 %v924_v13  ;;  %v2206_v13 = vld [vmem:[%s2789_s14 + $0x8] sm:$0xff] }
 0x15a   : > { %v921_v15 = vpop.f32.mrf.mxu3 }
 0x15b   : > { %v922_v16 = vadd.f32 %v2860_v14, %v921_v15 }
 0x15d   : > { %v927_v17 = vsel %vm794_vm1, %v922_v16, -inf }
 0x15e   : > { %928 = vmax.xlane.f32.xlu1 %v927_v17 }
 0x162   : > { %v1043_v33 = vpop.f32.mrf.mxu3 }
 0x163   : > { %2200 = vmatpush.xpose.msk.msra.mxu1 %vm794_vm1, %v1043_v33 }
 0x16a   : > { %v1046_v40 = vpop.f32.mrf.mxu3 }
 0x1c9   : > { %v926_v21 = vpop.xlane.xlu2 %925 }
 0x1ca   : > { %v930_v22 = vsub.f32 %v896_v12, %v926_v21 }
 0x1cc   : > { %v932_v23 = vmul.f32 1.442695, %v930_v22 }
 0x1ce   : > { %2347 = vpow2.f32 %v932_v23 }
 0x1d1   : > { %v929_v24 = vpop.xlane.xlu1 %928 }
 0x1d2   : > { %v931_v25 = vsub.f32 %v922_v16, %v929_v24 }
 0x1d4   : > { %v2348_v26 = vpop.eup %2347  ;;  %v934_v27 = vmul.f32 1.442695, %v931_v25 }
 0x1d5   : > { %v936_v28 = vsel %vm794_vm1, %v2348_v26, 0.0 }
 0x1d6   : > { %2349 = vpow2.f32 %v934_v27  ;;  %937 = vadd.xlane.f32.xlu2 %v936_v28 }
 0x1dc   : > { %v2350_v29 = vpop.eup %2349 }
 0x1dd   : > { %v939_v30 = vsel %vm794_vm1, %v2350_v29, 0.0 }
 0x1de   : > { %940 = vadd.xlane.f32.xlu1 %v939_v30 }
 0x249   : > { %v938_v34 = vpop.xlane.xlu2 %937 }
 0x24a   : > { %2351 = vrcp.f32 %v938_v34 }
 0x250   : > { %v2352_v35 = vpop.eup %2351 }
 0x251   : > { %v941_v36 = vpop.xlane.xlu1 %940  ;;  %v944_v37 = vmul.f32 %v2352_v35, %v2348_v26 }
 0x252   : > { %2353 = vrcp.f32 %v941_v36 }
 0x253   : > { %2192 = vmatmul.msk.f32.vlgmr.msrb.gmra.mxu0 %vm794_vm1, %v944_v37 }
 0x254   : > { %1216 = vmatpush.msrb.mxu0 %v2206_v13 }
 0x258   : > { %v2354_v38 = vpop.eup %2353 }
 0x259   : > { %v945_v39 = vmul.f32 %v2354_v38, %v2350_v29 }
 0x25b   : > { %2193 = vmatmul.msk.f32.vlgmr.msrb.gmra.mxu1 %vm794_vm1, %v945_v39  ;;  %2198 = vmatmul.msk.f32.vlgmr.msra.gmra.mxu0 %vm794_vm1, %v995_v19 }
 0x25c   : > { %2202 = vmatpush.xpose.msk.msrb.mxu1 %vm794_vm1, %v1046_v40  ;;  %1325 = vmatpush.msra.mxu0 %v2869_v18 }
 0x263   : > { %2199 = vmatmul.msk.f32.gmra.mxu0 %vm794_vm1, %v997_v20  ;;  %2201 = vmatmul.msk.f32.vlgmr.msra.gmra.mxu1 %vm794_vm1, %v1019_v41 }
 0x264   : > { %1245 = vmatpush.msra.mxu1 %v992_v43 }
 0x26b   : > { %2203 = vmatmul.msk.f32.vlgmr.msrb.gmra.mxu1 %vm794_vm1, %v1022_v42 }
 0x2d0   : > { %v966_v44 = vpop.f32.mrf.mxu0 }
 0x2d1   : > { %2209 = vmatmul.msk.f32.vlgmr.msra.gmra.mxu1 %vm794_vm1, %v966_v44 }
 0x2d8   : > { %v989_v45 = vpop.f32.mrf.mxu1  ;;  %v1067_v46 = vpop.f32.mrf.mxu0 }
 0x2d9   : > { %1165 = vmatpush.msra.mxu2 %v1067_v46  ;;  %2210 = vmatmul.msk.f32.gmra.mxu1 %vm794_vm1, %v989_v45 }
 0x2db   : > { %1277 = vmatpush.msrb.mxu2 %v2835_v4 }
 0x2e0   : > { %v1070_v47 = vpop.f32.mrf.mxu0  ;;  %v1096_v48 = vpop.f32.mrf.mxu1 }
 0x2e1   : > { %v1097_v49 = vadd.f32 %v2856_v10, %v1096_v48  ;;  %1188 = vmatpush.msrb.mxu3 %v1070_v47 }
 0x2e3   : > { %1301 = vmatpush.msra.mxu3 %v2831_v2  ;;  %v1125_v50 = vsel %vm794_vm1, %v1097_v49, -inf }
 0x2e4   : > { %1126 = vmax.xlane.f32.xlu1 %v1125_v50  ;;  %v2223_v50 = vld [vmem:[%s2789_s14 + $0x10] sm:$0xff] }
 0x2e8   : > { %v1122_v51 = vpop.f32.mrf.mxu1 }
 0x2e9   : > { %v1123_v52 = vadd.f32 %v2860_v14, %v1122_v51 }
 0x2eb   : > { %v1128_v53 = vsel %vm794_vm1, %v1123_v52, -inf }
 0x2ec   : > { %1129 = vmax.xlane.f32.xlu0 %v1128_v53 }
 0x357   : > { %v1127_v54 = vpop.xlane.xlu1 %1126 }
 0x358   : > { %v1131_v55 = vsub.f32 %v1097_v49, %v1127_v54 }
 0x35a   : > { %v1133_v56 = vmul.f32 1.442695, %v1131_v55 }
 0x35c   : > { %2355 = vpow2.f32 %v1133_v56 }
 0x35f   : > { %v1130_v57 = vpop.xlane.xlu0 %1129 }
 0x360   : > { %v1132_v58 = vsub.f32 %v1123_v52, %v1130_v57 }
 0x362   : > { %v2356_v59 = vpop.eup %2355  ;;  %v1135_v60 = vmul.f32 1.442695, %v1132_v58 }
 0x363   : > { %v1137_v61 = vsel %vm794_vm1, %v2356_v59, 0.0 }
 0x364   : > { %2357 = vpow2.f32 %v1135_v60  ;;  %1138 = vadd.xlane.f32.xlu1 %v1137_v61 }
 0x36a   : > { %v2358_v62 = vpop.eup %2357 }
 0x36b   : > { %v1140_v63 = vsel %vm794_vm1, %v2358_v62, 0.0 }
 0x36c   : > { %1141 = vadd.xlane.f32.xlu2 %v1140_v63 }
 0x37d   : > { %1256 = vrot.lane.b32.xlu1 %v2843_v5, %s2571_s20 }
 0x384   : > { %1254 = vrot.lane.b32.xlu2 %v2833_v3, %s2571_s20  ;;  %s2576_s20 = smov 8  }
 0x3d7   : > { %v1139_v0 = vpop.xlane.xlu1 %1138 }
 0x3d8   : > { %2359 = vrcp.f32 %v1139_v0 }
 0x3de   : > { %v2360_v1 = vpop.eup %2359 }
 0x3df   : > { %v1145_v6 = vmul.f32 %v2360_v1, %v2356_v59  ;;  %v1142_v7 = vpop.xlane.xlu2 %1141 }
 0x3e0   : > { %2361 = vrcp.f32 %v1142_v7 }
 0x3e1   : > { %2204 = vmatmul.msk.f32.vlgmr.msra.gmra.mxu2 %vm794_vm1, %v1145_v6 }
 0x3e6   : > { %v2362_v8 = vpop.eup %2361 }
 0x3e7   : > { %v1146_v9 = vmul.f32 %v2362_v8, %v2358_v62  ;;  %v1255_v11 = vpop.permute.xlu2 %1254 }
 0x3e9   : > { %2205 = vmatmul.msk.f32.vlgmr.msrb.gmra.mxu3 %vm794_vm1, %v1146_v9  ;;  %2211 = vmatmul.msk.f32.vlgmr.msrb.gmra.mxu2 %vm794_vm1, %v1255_v11 }
 0x3ef   : > { %v1257_v12 = vpop.permute.xlu1 %1256 }
 0x3f1   : > { %2213 = vmatmul.msk.f32.vlgmr.msra.gmra.mxu3 %vm794_vm1, %v1255_v11  ;;  %2212 = vmatmul.msk.f32.gmra.mxu2 %vm794_vm1, %v1257_v12 }
 0x3f9   : > { %2214 = vmatmul.msk.f32.gmra.mxu3 %vm794_vm1, %v1257_v12 }
 0x464   : > { %v1167_v15 = vpop.f32.mrf.mxu2 }
 0x465   : > { %2207 = vmatmul.msk.f32.vlgmr.msrb.gmra.mxu0 %vm794_vm1, %v1167_v15 }
 0x466   : > { %1534 = vmatpush.msrb.mxu0 %v2831_v2  ;;  %v2922_v2 = vpop.f32.mrf.mxu1 }
 0x46c   : > { %v1190_v16 = vpop.f32.mrf.mxu3  ;;  %v1279_v19 = vpop.f32.mrf.mxu2 }
 0x46d   : > { %2208 = vmatmul.msk.f32.gmra.mxu0 %vm794_vm1, %v1190_v16 }
 0x46e   : > { %v1250_v23 = vpop.f32.mrf.mxu1 }
 0x474   : > { %v1303_v17 = vpop.f32.mrf.mxu3  ;;  %v1282_v21 = vpop.f32.mrf.mxu2 }
 0x475   : > { %2215 = vmatmul.msk.f32.vlgmr.msra.gmra.mxu0 %vm794_vm1, %v1255_v11  ;;  %2217 = vmatpush.xpose.msk.msrb.mxu1 %vm794_vm1, %v1303_v17 }
 0x478   : > { %2218 = vmatmul.msk.f32.vlgmr.msrb.gmra.mxu1 %vm794_vm1, %v1279_v19 }
 0x47c   : > { %v1306_v20 = vpop.f32.mrf.mxu3 }
 0x47d   : > { %2216 = vmatmul.msk.f32.gmra.mxu0 %vm794_vm1, %v1257_v12  ;;  %2219 = vmatpush.xpose.msk.msra.mxu2 %vm794_vm1, %v1306_v20 }
 0x480   : > { %2220 = vmatmul.msk.f32.vlgmr.msra.gmra.mxu2 %vm794_vm1, %v1282_v21 }
 0x481   : > { %1476 = vmatpush.msrb.mxu2 %v2223_v50 }
 0x4e2   : > { %v2924_v22 = vpop.f32.mrf.mxu0 }
 0x4e3   : > { %v1248_v59 = vadd.f32 %v2922_v2, %v2924_v22 }
 0x4ea   : > { %v1221_v24 = vpop.f32.mrf.mxu0 }
 0x4eb   : > { %v2926_v25 = vadd.f32 %v1250_v23, %v1221_v24 }
 0x4f2   : > { %v1327_v26 = vpop.f32.mrf.mxu0 }
 0x4f3   : > { %1425 = vmatpush.msrb.mxu3 %v1327_v26  ;;  %v2238_v26 = vld [vmem:[%s2789_s14 + $0x18] sm:$0xff]  ;;  %s3108_s14 = sld [smem:[#allocation19_spill]] }
 0x4f5   : > { %1510 = vmatpush.msra.mxu3 %v2835_v4  ;;  %v1356_v27 = vpop.f32.mrf.mxu1 }
 0x4f6   : > { %v1357_v28 = vadd.f32 %v2856_v10, %v1356_v27 }
 0x4f8   : > { %v1385_v29 = vsel %vm794_vm1, %v1357_v28, -inf }
 0x4f9   : > { %1386 = vmax.xlane.f32.xlu2 %v1385_v29  ;;  %v2340_v29 = vld [vmem:[%s3107_s19] ss:$0 sm:$0xff] }
 0x4fa   : > { %v1330_v30 = vpop.f32.mrf.mxu0 }
 0x4fb   : > { %1448 = vmatpush.msra.mxu1 %v1330_v30 }
 0x4fd   : > { %1558 = vmatpush.msrb.mxu1 %v2869_v18 }
 0x503   : > { %v1382_v31 = vpop.f32.mrf.mxu2 }
 0x504   : > { %v1383_v32 = vadd.f32 %v2860_v14, %v1382_v31 }
 0x506   : > { %v1388_v33 = vsel %vm794_vm1, %v1383_v32, -inf }
 0x507   : > { %1389 = vmax.xlane.f32.xlu1 %v1388_v33 }
 0x511   : > { %1489 = vrot.lane.b32.xlu2 %v2843_v5, %s2572_s11 }
 0x56c   : > { %v1387_v4 = vpop.xlane.xlu2 %1386 }
 0x56d   : > { %v1391_v34 = vsub.f32 %v1357_v28, %v1387_v4 }
 0x56f   : > { %v1393_v35 = vmul.f32 1.442695, %v1391_v34 }
 0x571   : > { %2363 = vpow2.f32 %v1393_v35 }
 0x574   : > { %v1490_v49 = vpop.permute.xlu2 %1489 }
 0x577   : > { %v2364_v36 = vpop.eup %2363 }
 0x578   : > { %v1397_v37 = vsel %vm794_vm1, %v2364_v36, 0.0 }
 0x579   : > { %1398 = vadd.xlane.f32.xlu0 %v1397_v37 }
 0x57a   : > { %v1390_v38 = vpop.xlane.xlu1 %1389 }
 0x57b   : > { %v1392_v39 = vsub.f32 %v1383_v32, %v1390_v38 }
 0x57d   : > { %v1395_v18 = vmul.f32 1.442695, %v1392_v39  ;;  %v2573_v39 = vmov 32.0  }
 0x57f   : > { %2365 = vpow2.f32 %v1395_v18 }
 0x585   : > { %v2366_v40 = vpop.eup %2365 }
 0x586   : > { %v1400_v41 = vsel %vm794_vm1, %v2366_v40, 0.0 }
 0x587   : > { %1401 = vadd.xlane.f32.xlu0 %v1400_v41 }
 0x59b   : > { %1487 = vrot.lane.b32.xlu0 %v2833_v3, %s2572_s11 }
 0x5ec   : > { %v1399_v42 = vpop.xlane.xlu0 %1398 }
 0x5ed   : > { %2367 = vrcp.f32 %v1399_v42 }
 0x5f3   : > { %v2368_v43 = vpop.eup %2367 }
 0x5f4   : > { %v1405_v44 = vmul.f32 %v2368_v43, %v2364_v36 }
 0x5f6   : > { %2221 = vmatmul.msk.f32.vlgmr.msrb.gmra.mxu3 %vm794_vm1, %v1405_v44 }
 0x5fa   : > { %v1402_v45 = vpop.xlane.xlu0 %1401 }
 0x5fb   : > { %2369 = vrcp.f32 %v1402_v45 }
 0x601   : > { %v2370_v46 = vpop.eup %2369 }
 0x602   : > { %v1406_v47 = vmul.f32 %v2370_v46, %v2366_v40 }
 0x604   : > { %2222 = vmatmul.msk.f32.vlgmr.msra.gmra.mxu1 %vm794_vm1, %v1406_v47 }
 0x60d   : > { %v1488_v48 = vpop.permute.xlu0 %1487 }
 0x60e   : > { %2226 = vmatmul.msk.f32.vlgmr.msra.gmra.mxu3 %vm794_vm1, %v1488_v48  ;;  %2228 = vmatmul.msk.f32.vlgmr.msrb.gmra.mxu0 %vm794_vm1, %v1488_v48 }
 0x60f   : > { %2230 = vmatmul.msk.f32.vlgmr.msrb.gmra.mxu1 %vm794_vm1, %v1488_v48 }
 0x616   : > { %2227 = vmatmul.msk.f32.gmra.mxu3 %vm794_vm1, %v1490_v49  ;;  %2229 = vmatmul.msk.f32.gmra.mxu0 %vm794_vm1, %v1490_v49 }
 0x617   : > { %2231 = vmatmul.msk.f32.gmra.mxu1 %vm794_vm1, %v1490_v49 }
 0x679   : > { %v1427_v51 = vpop.f32.mrf.mxu3 }
 0x67a   : > { %2224 = vmatmul.msk.f32.vlgmr.msrb.gmra.mxu2 %vm794_vm1, %v1427_v51 }
 0x681   : > { %v1450_v52 = vpop.f32.mrf.mxu1 }
 0x682   : > { %2225 = vmatmul.msk.f32.gmra.mxu2 %vm794_vm1, %v1450_v52 }
 0x68b   : > { %v1536_v53 = vpop.f32.mrf.mxu0 }
 0x68c   : > { %v1560_v54 = vpop.f32.mrf.mxu1  ;;  %2232 = vmatpush.xpose.msk.msra.mxu2 %vm794_vm1, %v1536_v53  ;;  %v1794_v53 = vld [vmem:[%s2802_s17 + $0x18] sm:$0xff] }
 0x68d   : > { %1658 = vmatpush.msra.mxu1 %v1560_v54  ;;  %v1793_v54 = vld [vmem:[%s2802_s17 + $0x10] sm:$0xff] }
 0x690   : > { %1709 = vmatpush.msrb.mxu2 %v2238_v26 }
 0x691   : > { %v1512_v55 = vpop.f32.mrf.mxu3 }
 0x692   : > { %2233 = vmatmul.msk.f32.vlgmr.msra.gmra.mxu2 %vm794_vm1, %v1512_v55  ;;  %v1792_v55 = vld [vmem:[%s2802_s17 + $0x8] sm:$0xff] }
 0x693   : > { %v1539_v56 = vpop.f32.mrf.mxu0 }
 0x694   : > { %v1563_v57 = vpop.f32.mrf.mxu1  ;;  %2234 = vmatpush.xpose.msk.msrb.mxu3 %vm794_vm1, %v1539_v56  ;;  %v1791_v56 = vld [vmem:[%s2802_s17] sm:$0xff] }
 0x695   : > { %1681 = vmatpush.msrb.mxu1 %v1563_v57 }
 0x698   : > { %1817 = vmatpush.msra.mxu3 %v1794_v53 }
 0x699   : > { %v1515_v58 = vpop.f32.mrf.mxu3 }
 0x69a   : > { %2235 = vmatmul.msk.f32.vlgmr.msrb.gmra.mxu3 %vm794_vm1, %v1515_v58 }
 0x69b   : > { %1818 = vmatpush.msra.mxu3 %v1793_v54 }
 0x69d   : > { %1819 = vmatpush.msra.mxu3 %v1792_v55 }
 0x69f   : > { %1820 = vmatpush.msra.mxu3 %v1791_v56 }
 0x6fd   : > { %v1478_v60 = vpop.f32.mrf.mxu2 }
 0x6fe   : > { %v1484_v61 = vadd.f32 %v1478_v60, %v1248_v59  ;;  %v1837_v60 = vld [vmem:[%s2816_s18 + $0x38] sm:$0xff] }
 0x6ff   : > { %1857 = vmatpush.msra.mxu0 %v1837_v60 }
 0x705   : > { %v1481_v62 = vpop.f32.mrf.mxu2 }
 0x706   : > { %v1485_v63 = vadd.f32 %v1481_v62, %v2926_v25  ;;  %v1835_v62 = vld [vmem:[%s2816_s18 + $0x28] sm:$0xff] }
 0x715   : > { %v1589_v0 = vpop.f32.mrf.mxu2 }
 0x716   : > { %v1590_v1 = vadd.f32 %v2856_v10, %v1589_v0 }
 0x718   : > { %v1618_v6 = vsel %vm794_vm1, %v1590_v1, -inf }
 0x719   : > { %1619 = vmax.xlane.f32.xlu0 %v1618_v6 }
 0x71d   : > { %v1615_v7 = vpop.f32.mrf.mxu3 }
 0x71e   : > { %v1616_v8 = vadd.f32 %v2860_v14, %v1615_v7 }
 0x720   : > { %v1621_v9 = vsel %vm794_vm1, %v1616_v8, -inf }
 0x721   : > { %1622 = vmax.xlane.f32.xlu1 %v1621_v9 }
 0x78c   : > { %v1620_v11 = vpop.xlane.xlu0 %1619 }
 0x78d   : > { %v1624_v12 = vsub.f32 %v1590_v1, %v1620_v11  ;;  %v1834_v1 = vld [vmem:[%s2816_s18 + $0x20] sm:$0xff] }
 0x78f   : > { %v1626_v13 = vmul.f32 1.442695, %v1624_v12 }
 0x791   : > { %2371 = vpow2.f32 %v1626_v13 }
 0x794   : > { %v1623_v15 = vpop.xlane.xlu1 %1622 }
 0x795   : > { %v1625_v16 = vsub.f32 %v1616_v8, %v1623_v15  ;;  %v1833_v8 = vld [vmem:[%s2816_s18 + $0x18] sm:$0xff] }
 0x797   : > { %v2372_v17 = vpop.eup %2371  ;;  %v1628_v19 = vmul.f32 1.442695, %v1625_v16 }
 0x798   : > { %v1630_v20 = vsel %vm794_vm1, %v2372_v17, 0.0 }
 0x799   : > { %2373 = vpow2.f32 %v1628_v19  ;;  %1631 = vadd.xlane.f32.xlu1 %v1630_v20  ;;  %v2341_v19 = vld [vmem:[%s3109_s27] ss:$0 sm:$0xff] }
 0x79f   : > { %v2374_v10 = vpop.eup %2373 }
 0x7a0   : > { %v1633_v21 = vsel %vm794_vm1, %v2374_v10, 0.0 }
 0x7a1   : > { %1634 = vadd.xlane.f32.xlu2 %v1633_v21 }
 0x80c   : > { %v1632_v14 = vpop.xlane.xlu1 %1631 }
 0x80d   : > { %2375 = vrcp.f32 %v1632_v14  ;;  %v2342_v14 = vld [vmem:[%s3108_s14] ss:$0 sm:$0xff] }
 0x813   : > { %v2376_v2 = vpop.eup %2375 }
 0x814   : > { %v1638_v22 = vmul.f32 %v2376_v2, %v2372_v17  ;;  %v1635_v23 = vpop.xlane.xlu2 %1634 }
 0x815   : > { %2377 = vrcp.f32 %v1635_v23 }
 0x816   : > { %2236 = vmatmul.msk.f32.vlgmr.msra.gmra.mxu1 %vm794_vm1, %v1638_v22  ;;  %2379 = vrcp.f32 %v2573_v39  ;;  %v2344_v39 = vld [vmem:[%s769_s5] ss:$0 sm:$0xff] }
 0x81b   : > { %v2378_v24 = vpop.eup %2377 }
 0x81c   : > { %v1639_v25 = vmul.f32 %v2378_v24, %v2374_v10  ;;  %v2380_v18 = vpop.eup %2379 }
 0x81d   : > { %v1737_v40 = vmul.f32 32.0, %v2380_v18  ;;  %vm1741_vm3 = vweird.f32 %v2380_v18 }
 0x81e   : > { %2237 = vmatmul.msk.f32.vlgmr.msrb.gmra.mxu1 %vm794_vm1, %v1639_v25 }
 0x81f   : > { %v1738_v41 = vsub.f32 1.0, %v1737_v40 }
 0x821   : > { %v1739_v42 = vmul.f32 %v2380_v18, %v1738_v41 }
 0x823   : > { %v1740_v43 = vadd.f32 %v2380_v18, %v1739_v42 }
 0x893   : > { %v1660_v27 = vpop.f32.mrf.mxu1 }
 0x894   : > { %2239 = vmatmul.msk.f32.vlgmr.msrb.gmra.mxu2 %vm794_vm1, %v1660_v27 }
 0x89b   : > { %v1683_v28 = vpop.f32.mrf.mxu1 }
 0x89c   : > { %2240 = vmatmul.msk.f32.gmra.mxu2 %vm794_vm1, %v1683_v28 }
 0x917   : > { %v1711_v30 = vpop.f32.mrf.mxu2 }
 0x918   : > { %v1717_v31 = vadd.f32 %v1711_v30, %v1484_v61  ;;  %v1836_v61 = vld [vmem:[%s2816_s18 + $0x30] sm:$0xff] }
 0x919   : > { %1858 = vmatpush.msra.mxu0 %v1836_v61  ;;  %v1832_v30 = vld [vmem:[%s2816_s18 + $0x10] sm:$0xff] }
 0x91a   : > { %v1723_v32 = vadd.f32 %v2340_v29, %v1717_v31  ;;  %v1831_v31 = vld [vmem:[%s2816_s18 + $0x8] sm:$0xff] }
 0x91b   : > { %1859 = vmatpush.msra.mxu0 %v1835_v62 }
 0x91c   : > { %v1725_v33 = vadd.f32 %v1723_v32, %v2833_v3  ;;  %v2976_v3 = vsel %vm1741_vm3, %v2380_v18, %v1740_v43  ;;  %v1830_v32 = vld [vmem:[%s2816_s18] sm:$0xff] }
 0x91d   : > { %1860 = vmatpush.msra.mxu0 %v1834_v1 }
 0x91e   : > { %v1730_v4 = vsel %vm1729_vm2, %v1725_v33, 0.0 }
 0x91f   : > { %1731 = vadd.xlane.f32.xlu1 %v1730_v4  ;;  %v1714_v34 = vpop.f32.mrf.mxu2  ;;  %1861 = vmatpush.msra.mxu0 %v1833_v8 }
 0x920   : > { %v1718_v35 = vadd.f32 %v1714_v34, %v1485_v63 }
 0x921   : > { %1862 = vmatpush.msra.mxu0 %v1832_v30 }
 0x922   : > { %v1724_v36 = vadd.f32 %v2340_v29, %v1718_v35 }
 0x923   : > { %1863 = vmatpush.msra.mxu0 %v1831_v31 }
 0x924   : > { %v1726_v37 = vadd.f32 %v1724_v36, %v2843_v5 }
 0x925   : > { %1864 = vmatpush.msra.mxu0 %v1830_v32 }
 0x926   : > { %v1733_v38 = vsel %vm1729_vm2, %v1726_v37, 0.0 }
 0x927   : > { %1734 = vadd.xlane.f32.xlu1 %v1733_v38 }
 0x992   : > { %v1732_v44 = vpop.xlane.xlu1 %1731 }
 0x993   : > { %v1743_v45 = vmul.f32 %v2976_v3, %v1732_v44 }
 0x995   : > { %v1745_v5 = vsub.f32 %v1725_v33, %v1743_v45  ;;  %v2343_v33 = vld [vmem:[%s761_s26] ss:$0 sm:$0xff] }
 0x997   : > { %v1747_v46 = vmul.f32 %v1745_v5, %v1745_v5 }
 0x999   : > { %v1749_v47 = vsel %vm1729_vm2, %v1747_v46, 0.0 }
 0x99a   : > { %1750 = vadd.xlane.f32.xlu1 %v1749_v47  ;;  %v1735_v48 = vpop.xlane.xlu1 %1734 }
 0x99b   : > { %v1744_v49 = vmul.f32 %v2976_v3, %v1735_v48 }
 0x99d   : > { %v1746_v50 = vsub.f32 %v1726_v37, %v1744_v49 }
 0x99f   : > { %v1748_v51 = vmul.f32 %v1746_v50, %v1746_v50 }
 0x9a1   : > { %v1752_v52 = vsel %vm1729_vm2, %v1748_v51, 0.0 }
 0x9a2   : > { %1753 = vadd.xlane.f32.xlu0 %v1752_v52 }
 0xa0d   : > { %v1751_v57 = vpop.xlane.xlu1 %1750 }
 0xa0e   : > { %v1755_v58 = vmul.f32 %v1751_v57, %v2976_v3 }
 0xa10   : > { %v1757_v59 = vadd.f32 1e-05, %v1755_v58 }
 0xa12   : > { %2381 = vrsqrt.f32 %v1757_v59  ;;  %vm1765_vm5 = vweird.f32 %v1757_v59 }
 0xa15   : > { %v1754_v63 = vpop.xlane.xlu0 %1753 }
 0xa16   : > { %v1756_v0 = vmul.f32 %v1754_v63, %v2976_v3 }
 0xa18   : > { %v2382_v6 = vpop.eup %2381  ;;  %v1758_v7 = vadd.f32 1e-05, %v1756_v0 }
 0xa19   : > { %v1760_v9 = vmul.f32 %v2382_v6, %v1757_v59  ;;  %vm1766_vm4 = vweird.f32 %v2382_v6 }
 0xa1a   : > { %2383 = vrsqrt.f32 %v1758_v7  ;;  %vm1767_vm6 = vmor %vm1765_vm5, %vm1766_vm4  ;;  %vm1775_vm8 = vweird.f32 %v1758_v7 }
 0xa1b   : > { %v1761_v11 = vmul.f32 %v2382_v6, %v1760_v9 }
 0xa1d   : > { %v1762_v12 = vmul.f32 0.5, %v1761_v11  ;;  %v2345_v11 = vld [vmem:[%s772_s2] ss:$0 sm:$0xff]  ;;  %s1940_s2 = sshll.u32 %s2574_s0, 4  ;;  %s1941_s2 = int_to_ptr.vmem [resolvable:$true] %s1940_s2 }
 0xa1f   : > { %v1763_v13 = vsub.f32 1.5, %v1762_v12 }
 0xa20   : > { %v2384_v15 = vpop.eup %2383 }
 0xa21   : > { %v1764_v16 = vmul.f32 %v2382_v6, %v1763_v13  ;;  %v1770_v17 = vmul.f32 %v2384_v15, %v1758_v7  ;;  %vm1776_vm7 = vweird.f32 %v2384_v15  ;;  %v2346_v13 = vld [vmem:[%s2822_s24] ss:$0 sm:$0xff]  ;;  %s1942_s24 = sshll.u32 %s3112_s29, 4  ;;  %s1943_s24 = int_to_ptr.hbm [resolvable:$true] %s1942_s24 }
 0xa22   : > { %vm1777_vm9 = vmor %vm1775_vm8, %vm1776_vm7 }
 0xa23   : > { %v1768_v20 = vsel %vm1767_vm6, %v2382_v6, %v1764_v16  ;;  %v1771_v10 = vmul.f32 %v2384_v15, %v1770_v17 }
 0xa24   : > { %v1779_v21 = vmul.f32 %v1768_v20, %v1745_v5 }
 0xa25   : > { %v1772_v2 = vmul.f32 0.5, %v1771_v10 }
 0xa26   : > { %v1784_v22 = vmul.f32 %v2341_v19, %v1779_v21 }
 0xa27   : > { %v1773_v23 = vsub.f32 1.5, %v1772_v2 }
 0xa28   : > { %v1789_v24 = vadd.f32 %v2342_v14, %v1784_v22 }
 0xa29   : > { %v1774_v25 = vmul.f32 %v2384_v15, %v1773_v23 }
 0xa2a   : > { %2241 = vmatmul.msk.f32.vlgmr.msra.gmra.mxu3 %vm1729_vm2, %v1789_v24 }
 0xa2b   : > { %v1778_v26 = vsel %vm1777_vm9, %v2384_v15, %v1774_v25 }
 0xa2c   : > { %v1780_v27 = vmul.f32 %v1778_v26, %v1746_v50 }
 0xa2e   : > { %v1785_v28 = vmul.f32 %v2341_v19, %v1780_v27 }
 0xa30   : > { %v1790_v29 = vadd.f32 %v2342_v14, %v1785_v28 }
 0xa32   : > { %2242 = vmatmul.msk.f32.gmra.mxu3 %vm1729_vm2, %v1790_v29 }
 0xaad   : > { %v1822_v4 = vpop.f32.mrf.mxu3 }
 0xaae   : > { %v1823_v34 = vadd.f32 %v2343_v33, %v1822_v4 }
 0xab0   : > { %v1828_v35 = vmax.f32 %v1823_v34, 0.0 }
 0xab2   : > { %2243 = vmatmul.msk.f32.vlgmr.msra.gmra.mxu0 %vm1842_vm10, %v1828_v35 }
 0xab5   : > { %v1825_v36 = vpop.f32.mrf.mxu3 }
 0xab6   : > { %v1826_v37 = vadd.f32 %v2343_v33, %v1825_v36 }
 0xab8   : > { %v1829_v38 = vmax.f32 %v1826_v37, 0.0 }
 0xaba   : > { %2244 = vmatmul.msk.f32.gmra.mxu0 %vm1842_vm10, %v1829_v38 }
 0xb2f   : > { %v1866_v18 = vpop.f32.mrf.mxu0 }
 0xb30   : > { %v1867_v40 = vadd.f32 %v2344_v39, %v1866_v18 }
 0xb32   : > { %v1872_v41 = vadd.f32 %v1867_v40, %v1789_v24 }
 0xb34   : > { %v1876_v42 = vsel %vm1729_vm2, %v1872_v41, 0.0 }
 0xb35   : > { %1877 = vadd.xlane.f32.xlu1 %v1876_v42 }
 0xb37   : > { %v1869_v43 = vpop.f32.mrf.mxu0 }
 0xb38   : > { %v1870_v44 = vadd.f32 %v2344_v39, %v1869_v43 }
 0xb3a   : > { %v1873_v45 = vadd.f32 %v1870_v44, %v1790_v29 }
 0xb3c   : > { %v1879_v5 = vsel %vm1729_vm2, %v1873_v45, 0.0 }
 0xb3d   : > { %1880 = vadd.xlane.f32.xlu0 %v1879_v5 }
 0xba8   : > { %v1878_v46 = vpop.xlane.xlu1 %1877 }
 0xba9   : > { %v1882_v47 = vmul.f32 %v1878_v46, %v2976_v3 }
 0xbab   : > { %v1884_v48 = vsub.f32 %v1872_v41, %v1882_v47 }
 0xbad   : > { %v1886_v49 = vmul.f32 %v1884_v48, %v1884_v48 }
 0xbaf   : > { %v1888_v50 = vsel %vm1729_vm2, %v1886_v49, 0.0 }
 0xbb0   : > { %v1881_v51 = vpop.xlane.xlu0 %1880  ;;  %1889 = vadd.xlane.f32.xlu1 %v1888_v50 }
 0xbb1   : > { %v1883_v52 = vmul.f32 %v1881_v51, %v2976_v3 }
 0xbb3   : > { %v1885_v53 = vsub.f32 %v1873_v45, %v1883_v52 }
 0xbb5   : > { %v1887_v54 = vmul.f32 %v1885_v53, %v1885_v53 }
 0xbb7   : > { %v1891_v55 = vsel %vm1729_vm2, %v1887_v54, 0.0 }
 0xbb8   : > { %1892 = vadd.xlane.f32.xlu0 %v1891_v55 }
 0xc23   : > { %v1890_v56 = vpop.xlane.xlu1 %1889 }
 0xc24   : > { %v1894_v57 = vmul.f32 %v1890_v56, %v2976_v3 }
 0xc26   : > { %v1896_v58 = vadd.f32 1e-05, %v1894_v57 }
 0xc28   : > { %2385 = vrsqrt.f32 %v1896_v58  ;;  %vm1904_vm12 = vweird.f32 %v1896_v58 }
 0xc2b   : > { %v1893_v59 = vpop.xlane.xlu0 %1892 }
 0xc2c   : > { %v1895_v60 = vmul.f32 %v1893_v59, %v2976_v3 }
 0xc2e   : > { %v2386_v61 = vpop.eup %2385  ;;  %v1897_v62 = vadd.f32 1e-05, %v1895_v60 }
 0xc2f   : > { %v1899_v63 = vmul.f32 %v2386_v61, %v1896_v58  ;;  %vm1905_vm11 = vweird.f32 %v2386_v61 }
 0xc30   : > { %2387 = vrsqrt.f32 %v1897_v62  ;;  %vm1906_vm13 = vmor %vm1904_vm12, %vm1905_vm11  ;;  %vm1914_vm15 = vweird.f32 %v1897_v62 }
 0xc31   : > { %v1900_v0 = vmul.f32 %v2386_v61, %v1899_v63 }
 0xc33   : > { %v1901_v1 = vmul.f32 0.5, %v1900_v0 }
 0xc35   : > { %v1902_v6 = vsub.f32 1.5, %v1901_v1 }
 0xc36   : > { %v2388_v7 = vpop.eup %2387 }
 0xc37   : > { %v1903_v8 = vmul.f32 %v2386_v61, %v1902_v6  ;;  %v1909_v9 = vmul.f32 %v2388_v7, %v1897_v62  ;;  %vm1915_vm14 = vweird.f32 %v2388_v7 }
 0xc38   : > { %vm1916_vm0 = vmor %vm1914_vm15, %vm1915_vm14 }
 0xc39   : > { %v1907_v3 = vsel %vm1906_vm13, %v2386_v61, %v1903_v8  ;;  %v1910_v12 = vmul.f32 %v2388_v7, %v1909_v9 }
 0xc3a   : > { %v1918_v15 = vmul.f32 %v1907_v3, %v1884_v48 }
 0xc3b   : > { %v1911_v16 = vmul.f32 0.5, %v1910_v12 }
 0xc3c   : > { %v1923_v17 = vmul.f32 %v2345_v11, %v1918_v15 }
 0xc3d   : > { %v1912_v19 = vsub.f32 1.5, %v1911_v16 }
 0xc3e   : > { %v1928_v20 = vadd.f32 %v2346_v13, %v1923_v17 }
 0xc3f   : > { %v1913_v10 = vmul.f32 %v2388_v7, %v1912_v19 }
 0xc40   : > { %1930 = vst.msk [vmem:[#allocation8] sm:$0xff] %vm1729_vm2, %v1928_v20 }
 0xc41   : > { %v1917_v21 = vsel %vm1916_vm0, %v2388_v7, %v1913_v10 }
 0xc42   : > { %v1919_v14 = vmul.f32 %v1917_v21, %v1885_v53 }
 0xc44   : > { %v1924_v2 = vmul.f32 %v2345_v11, %v1919_v14 }
 0xc46   : > { %v1929_v22 = vadd.f32 %v2346_v13, %v1924_v2 }
 0xc48   : > { %1931 = vst.msk [vmem:[#allocation8 + $0x8] sm:$0xff] %vm1729_vm2, %v1929_v22 }
 0xc49   : > { %2261 = dma.vmem_to_hbm [thread:$0]  (%p2278_p3), %s1941_s2, 256, %s1943_s24, [#allocation4], %s2575_s13, %s2575_s13, %s2576_s20  }
 0xc4a   : > { %2540 = dma.done.wait (%p2278_p3), [#allocation4], 256  }
 0xc4b   : > { %2542 = vsyncadd (%p2278_p3), [#allocation4], 4294967040 }
 0xc4c PF: > { %s3113_s11 = sld [smem:[#allocation15_spill]] }
 0xc4d   : > { %s3114_s18 = sld [smem:[#allocation12_spill]] }
 0xc4e   : > { %s3115_s19 = sld [smem:[#allocation13_spill]] }
 0xc4f   : > { %s3116_s20 = sld [smem:[#allocation17_spill]] }
 0xc50   : > { %s3117_s21 = sld [smem:[#allocation14_spill]] }
 0xc51   : > { %s3118_s22 = sld [smem:[#allocation16_spill]] }
 0xc52   : > { %s30_s23 = sadd.s32 1, %s3113_s11  }
 0xc53   : > { %p27_p4 = scmp.ge.s32.totalorder %s30_s23, 4  }
 0xc55   :  { %29 = sbr.rel (!%p27_p4) target bundleno = 17 (0x11), region = 178 }
 0xc5a   :  { %1959 = vsyncpa [#allocation3], 1 }
 0xc5b   :  { %1961 = vsyncpa [#allocation3 + $0x1], 1 }
 0xc5c   :  { %1962 = vsyncpa [#allocation6], 1 }
 0xc5d   :  { %1964 = vsyncpa [#allocation6 + $0x1], 1 }
 0xc5e   :  { %1965 = vsyncpa [#allocation4], 1 }
 0xc5f   :  { %1967 = vsyncpa [#allocation4 + $0x1], 1 }

</bundles_post_ra>
